<compile_context>
chip_gen: v7x
topology: tpu7x:2x2x1
jax: 0.10.0
libtpu: 0.0.40
codegen_flags: <defaults>
</compile_context>

<pallas_src>
import math
import jax
import jax.numpy as jnp
from jax import lax
from jax.experimental import pallas as pl
from jax.experimental.pallas import tpu as pltpu


# ---------------------------------------------------------------------------
# Kernels
# ---------------------------------------------------------------------------

def _normalize_f32(z):
    # F.normalize(z, dim=1): z / max(||z||_2, 1e-12)  ==  z * rsqrt(max(||z||^2, 1e-24))
    sq = jnp.sum(z * z, axis=1, keepdims=True)
    return z * lax.rsqrt(jnp.maximum(sq, 1e-24))


def mapping_kernel_resident(z_ref, w_ref, b_ref, out_ref):
    # z_ref:   (TB, F)      one batch tile (f32)
    # w_ref:   (L, F, F)    all layer weights, pre-transposed (in x out), pre-scaled,
    #                       in the compute dtype, single-buffered (resident)
    # b_ref:   (L, 1, F)    all layer biases (f32), directly broadcastable
    # out_ref: (TB, F)
    n_layers = w_ref.shape[0]

    x = _normalize_f32(z_ref[...].astype(jnp.float32)).astype(w_ref.dtype)

    for l in range(n_layers):                               # static unroll
        y = jnp.dot(x, w_ref[l], preferred_element_type=jnp.float32)
        y = y + b_ref[l]                                     # (1, F) broadcast, no relayout
        # LeakyReLU(0.2) in f32 (accumulator dtype); carry activations in compute dtype.
        x = jnp.maximum(y, 0.2 * y).astype(w_ref.dtype)

    out_ref[...] = x.astype(out_ref.dtype)


def mapping_kernel_streamed(z_ref, w_ref, b_ref, out_ref, x_scr):
    # Grid: (batch_tiles, n_layers); layers is the innermost "arbitrary" axis.
    # w_ref:  (1, F, F)   current layer's weights (double-buffered by the pipeline,
    #                     so layer l+1 weight DMA overlaps layer l compute)
    # b_ref:  (1, 1, F)   current layer's bias
    # x_scr:  (TB, F)     activation carried across the layer axis (compute dtype)
    l = pl.program_id(1)

    @pl.when(l == 0)
    def _():
        x_scr[...] = _normalize_f32(z_ref[...].astype(jnp.float32)).astype(x_scr.dtype)

    y = jnp.dot(x_scr[...], w_ref[0], preferred_element_type=jnp.float32)
    y = y + b_ref[0]
    x = jnp.maximum(y, 0.2 * y)
    x_scr[...] = x.astype(x_scr.dtype)

    @pl.when(l == pl.num_programs(1) - 1)
    def _():
        out_ref[...] = x.astype(out_ref.dtype)


# ---------------------------------------------------------------------------
# Wrappers
# ---------------------------------------------------------------------------

def prepare_mapping_params(weights, biases, compute_dtype=jnp.bfloat16):
    """One-time parameter preprocessing (do at model init, not per forward call).

    weights: (L, F_out, F_in) torch convention; biases: (L, F_out).
    Returns w_t: (L, F_in, F_out) pre-scaled by 1/sqrt(F_in) in compute_dtype,
            b:   (L, 1, F_out) f32.
    """
    L, F_out, F_in = weights.shape
    c = 1.0 / math.sqrt(F_in)
    w_t = (jnp.transpose(weights, (0, 2, 1)) * c).astype(compute_dtype)
    b = biases.reshape(L, 1, F_out).astype(jnp.float32)
    return w_t, b


def _vmem_capacity_bytes():
    try:
        return int(pltpu.get_tpu_info().vmem_capacity_bytes)
    except Exception:
        return 64 << 20  # smallest per-TC VMEM across v5e/v6e/v7x -> safe fallback


def mapping_network(z, w_t, b, *, batch_tile=None, path="auto"):
    """z: (B, F) f32; (w_t, b) from prepare_mapping_params.

    path: "auto" (pick by VMEM fit), "resident", or "stream".
    """
    B, F = z.shape
    L = w_t.shape[0]
    compute_dtype = w_t.dtype
    w_itemsize = jnp.dtype(compute_dtype).itemsize

    # Batch tiling: one tile covering B when B <= 512 (avoids per-step overhead and
    # keeps the MXU M-dimension >= 256 on v6e/v7x whenever the batch allows); for
    # large B use ~512-row tiles so activation DMA pipelines under compute.
    if batch_tile is None:
        if B <= 512:
            batch_tile = B
        else:
            batch_tile = 512
            while B % batch_tile != 0 and batch_tile > 8:
                batch_tile -= 8
            if B % batch_tile != 0:
                batch_tile = B
    assert B % batch_tile == 0, "batch must be divisible by batch_tile"
    assert batch_tile == B or batch_tile % 8 == 0, "batch_tile should be a multiple of 8"

    budget = int(0.75 * _vmem_capacity_bytes())   # ~48 MiB on v7x, ~96 MiB on v5e/v6e
    slack = 4 << 20                               # compiler internal scratch headroom
    io_bytes = 2 * batch_tile * F * z.dtype.itemsize * 2   # in + out, double-buffered

    w_resident = L * F * F * w_itemsize           # Buffered(1): no 2x
    b_resident = L * F * 4
    resident_bytes = w_resident + b_resident + io_bytes + slack

    use_resident = (path == "resident") or (path == "auto" and resident_bytes <= budget)

    if use_resident:
        vmem_limit = int(min(budget, max(resident_bytes, 16 << 20)))
        grid = (B // batch_tile,)
        return pl.pallas_call(
            mapping_kernel_resident,
            out_shape=jax.ShapeDtypeStruct((B, F), z.dtype),
            grid_spec=pltpu.PrefetchScalarGridSpec(
                num_scalar_prefetch=0,
                grid=grid,
                in_specs=[
                    pl.BlockSpec((batch_tile, F), lambda i: (i, 0)),
                    # Constant block + Buffered(1): weights/biases DMA'd once, resident.
                    pl.BlockSpec((L, F, F), lambda i: (0, 0, 0),
                                 pipeline_mode=pl.Buffered(1)),
                    pl.BlockSpec((L, 1, F), lambda i: (0, 0, 0),
                                 pipeline_mode=pl.Buffered(1)),
                ],
                out_specs=pl.BlockSpec((batch_tile, F), lambda i: (i, 0)),
            ),
            compiler_params=pltpu.CompilerParams(
                dimension_semantics=("parallel",),
                vmem_limit_bytes=vmem_limit,
            ),
        )(z, w_t, b)

    # Streaming path: per-layer weight blocks on an inner "arbitrary" grid axis.
    stream_bytes = (2 * F * F * w_itemsize          # double-buffered layer weights
                    + 2 * F * 4                     # double-buffered layer bias
                    + batch_tile * F * w_itemsize   # activation scratch
                    + io_bytes + slack)
    vmem_limit = int(min(budget, max(stream_bytes, 16 << 20)))
    grid = (B // batch_tile, L)
    return pl.pallas_call(
        mapping_kernel_streamed,
        out_shape=jax.ShapeDtypeStruct((B, F), z.dtype),
        grid_spec=pltpu.PrefetchScalarGridSpec(
            num_scalar_prefetch=0,
            grid=grid,
            in_specs=[
                pl.BlockSpec((batch_tile, F), lambda i, l: (i, 0)),
                pl.BlockSpec((1, F, F), lambda i, l: (l, 0, 0)),
                pl.BlockSpec((1, 1, F), lambda i, l: (l, 0, 0)),
            ],
            out_specs=pl.BlockSpec((batch_tile, F), lambda i, l: (i, 0)),
            scratch_shapes=[pltpu.VMEM((batch_tile, F), compute_dtype)],
        ),
        compiler_params=pltpu.CompilerParams(
            dimension_semantics=("parallel", "arbitrary"),
            vmem_limit_bytes=vmem_limit,
        ),
    )(z, w_t, b)


def reference_mapping_network(z, weights, biases, compute_dtype=jnp.float32):
    """Pure-JAX reference matching the PyTorch forward (optional compute-dtype cast
    mirroring the kernel's MXU path; accumulation always f32)."""
    F_ = z.shape[1]
    c = 1.0 / math.sqrt(F_)
    sq = jnp.sum(z * z, axis=1, keepdims=True)
    x = z * lax.rsqrt(jnp.maximum(sq, 1e-24))
    w_t = (jnp.transpose(weights, (0, 2, 1)) * c).astype(compute_dtype)
    for l in range(weights.shape[0]):
        y = jnp.dot(x.astype(compute_dtype), w_t[l],
                    preferred_element_type=jnp.float32) + biases[l][None, :]
        x = jnp.maximum(y, 0.2 * y)
    return x


if __name__ == "__main__":
    features = 128     # lane-dense (multiple of 128) -> unmasked stores
    n_layers = 8
    batch = 64

    key = jax.random.PRNGKey(0)
    kz, kw = jax.random.split(key)

    # Deterministic synthetic parameters (EqualizedWeight init: standard normal;
    # EqualizedLinear bias init: zeros).
    z = jax.random.normal(kz, (batch, features), dtype=jnp.float32)
    weights = jax.random.normal(kw, (n_layers, features, features), dtype=jnp.float32)
    biases = jnp.zeros((n_layers, features), dtype=jnp.float32)

    # 1) Exact-semantics check: f32 compute, resident-weight path.
    w_f32, b_f32 = prepare_mapping_params(weights, biases, compute_dtype=jnp.float32)
    ref_f32 = reference_mapping_network(z, weights, biases, compute_dtype=jnp.float32)

    out_res = jax.block_until_ready(mapping_network(z, w_f32, b_f32, path="resident"))
    assert out_res.shape == (batch, features)
    assert jnp.allclose(out_res, ref_f32, atol=1e-4, rtol=1e-4), "f32 resident mismatch"

    # 2) Streaming path (used automatically for large F on small-VMEM parts, e.g. v7x):
    #    verify it compiles and matches too.
    out_str = jax.block_until_ready(mapping_network(z, w_f32, b_f32, path="stream"))
    assert jnp.allclose(out_str, ref_f32, atol=1e-4, rtol=1e-4), "f32 streamed mismatch"

    # 3) Performance path: bf16 MXU compute (f32 accumulation), auto path selection.
    w_bf16, b2 = prepare_mapping_params(weights, biases, compute_dtype=jnp.bfloat16)
    out_bf16 = jax.block_until_ready(mapping_network(z, w_bf16, b2))
    ref_bf16 = reference_mapping_network(z, weights, biases, compute_dtype=jnp.bfloat16)
    assert jnp.allclose(out_bf16, ref_bf16, atol=1e-3, rtol=1e-2), "bf16 mismatch"

    print("KERNEL_OK")
</pallas_src>

<mosaic_0001>
module attributes {stable_mosaic.version = 11 : i64} {
  func.func @mapping_kernel_resident(%arg0: i32, %arg1: memref<64x128xf32, #tpu.memory_space<vmem>>, %arg2: memref<8x128x128xf32, #tpu.memory_space<vmem>>, %arg3: memref<8x1x128xf32, #tpu.memory_space<vmem>>, %arg4: memref<64x128xf32, #tpu.memory_space<vmem>>) attributes {dimension_semantics = [#tpu.dimension_semantics<parallel>], iteration_bounds = array<i64: 1>, scalar_prefetch = 0 : i64, scratch_operands = 0 : i64, tpu.core_type = #tpu.core_type<tc>, window_params = [{transform_indices = @transform_0, window_bounds = array<i64: 64, 128>}, {pipeline_mode = #tpu.pipeline_mode<synchronous>, transform_indices = @transform_1, window_bounds = array<i64: 8, 128, 128>}, {pipeline_mode = #tpu.pipeline_mode<synchronous>, transform_indices = @transform_2, window_bounds = array<i64: 8, 1, 128>}, {transform_indices = @transform_3, window_bounds = array<i64: 64, 128>}]} {
    %c0 = arith.constant 0 : index
    %c0_0 = arith.constant 0 : index
    %0 = vector.load %arg1[%c0, %c0_0] : memref<64x128xf32, #tpu.memory_space<vmem>>, vector<64x128xf32>
    %1 = arith.mulf %0, %0 : vector<64x128xf32>
    %cst = arith.constant dense<0.000000e+00> : vector<64xf32>
    %2 = vector.multi_reduction <add>, %1, %cst [1] : vector<64x128xf32> to vector<64xf32>
    %3 = vector.shape_cast %2 : vector<64xf32> to vector<64x1xf32>
    %cst_1 = arith.constant 1.000000e-24 : f32
    %4 = vector.broadcast %cst_1 : f32 to vector<64x1xf32>
    %5 = arith.maximumf %3, %4 : vector<64x1xf32>
    %6 = math.rsqrt %5 : vector<64x1xf32>
    %7 = vector.broadcast %6 : vector<64x1xf32> to vector<64x128xf32>
    %8 = arith.mulf %0, %7 : vector<64x128xf32>
    %c0_2 = arith.constant 0 : index
    %c0_3 = arith.constant 0 : index
    %c0_4 = arith.constant 0 : index
    %9 = vector.load %arg2[%c0_2, %c0_3, %c0_4] : memref<8x128x128xf32, #tpu.memory_space<vmem>>, vector<1x128x128xf32>
    %10 = vector.shape_cast %9 : vector<1x128x128xf32> to vector<128x128xf32>
    %cst_5 = arith.constant dense<0.000000e+00> : vector<64x128xf32>
    %11 = tpu.matmul %8, %10, %cst_5 {dimension_numbers = #tpu.dot_dimension_numbers<[1], [0], [0], [1], [0, 0, 1, 1], [], []>} : vector<64x128xf32>, vector<128x128xf32>, vector<64x128xf32> -> vector<64x128xf32>
    %c0_6 = arith.constant 0 : index
    %c0_7 = arith.constant 0 : index
    %c0_8 = arith.constant 0 : index
    %12 = vector.load %arg3[%c0_6, %c0_7, %c0_8] : memref<8x1x128xf32, #tpu.memory_space<vmem>>, vector<1x1x128xf32>
    %13 = vector.shape_cast %12 : vector<1x1x128xf32> to vector<1x128xf32>
    %14 = vector.broadcast %13 : vector<1x128xf32> to vector<64x128xf32>
    %15 = arith.addf %11, %14 : vector<64x128xf32>
    %cst_9 = arith.constant 2.000000e-01 : f32
    %16 = vector.broadcast %cst_9 : f32 to vector<64x128xf32>
    %17 = arith.mulf %16, %15 : vector<64x128xf32>
    %18 = arith.maximumf %15, %17 : vector<64x128xf32>
    %c1 = arith.constant 1 : index
    %c0_10 = arith.constant 0 : index
    %c0_11 = arith.constant 0 : index
    %19 = vector.load %arg2[%c1, %c0_10, %c0_11] : memref<8x128x128xf32, #tpu.memory_space<vmem>>, vector<1x128x128xf32>
    %20 = vector.shape_cast %19 : vector<1x128x128xf32> to vector<128x128xf32>
    %cst_12 = arith.constant dense<0.000000e+00> : vector<64x128xf32>
    %21 = tpu.matmul %18, %20, %cst_12 {dimension_numbers = #tpu.dot_dimension_numbers<[1], [0], [0], [1], [0, 0, 1, 1], [], []>} : vector<64x128xf32>, vector<128x128xf32>, vector<64x128xf32> -> vector<64x128xf32>
    %c1_13 = arith.constant 1 : index
    %c0_14 = arith.constant 0 : index
    %c0_15 = arith.constant 0 : index
    %22 = vector.load %arg3[%c1_13, %c0_14, %c0_15] : memref<8x1x128xf32, #tpu.memory_space<vmem>>, vector<1x1x128xf32>
    %23 = vector.shape_cast %22 : vector<1x1x128xf32> to vector<1x128xf32>
    %24 = vector.broadcast %23 : vector<1x128xf32> to vector<64x128xf32>
    %25 = arith.addf %21, %24 : vector<64x128xf32>
    %cst_16 = arith.constant 2.000000e-01 : f32
    %26 = vector.broadcast %cst_16 : f32 to vector<64x128xf32>
    %27 = arith.mulf %26, %25 : vector<64x128xf32>
    %28 = arith.maximumf %25, %27 : vector<64x128xf32>
    %c2 = arith.constant 2 : index
    %c0_17 = arith.constant 0 : index
    %c0_18 = arith.constant 0 : index
    %29 = vector.load %arg2[%c2, %c0_17, %c0_18] : memref<8x128x128xf32, #tpu.memory_space<vmem>>, vector<1x128x128xf32>
    %30 = vector.shape_cast %29 : vector<1x128x128xf32> to vector<128x128xf32>
    %cst_19 = arith.constant dense<0.000000e+00> : vector<64x128xf32>
    %31 = tpu.matmul %28, %30, %cst_19 {dimension_numbers = #tpu.dot_dimension_numbers<[1], [0], [0], [1], [0, 0, 1, 1], [], []>} : vector<64x128xf32>, vector<128x128xf32>, vector<64x128xf32> -> vector<64x128xf32>
    %c2_20 = arith.constant 2 : index
    %c0_21 = arith.constant 0 : index
    %c0_22 = arith.constant 0 : index
    %32 = vector.load %arg3[%c2_20, %c0_21, %c0_22] : memref<8x1x128xf32, #tpu.memory_space<vmem>>, vector<1x1x128xf32>
    %33 = vector.shape_cast %32 : vector<1x1x128xf32> to vector<1x128xf32>
    %34 = vector.broadcast %33 : vector<1x128xf32> to vector<64x128xf32>
    %35 = arith.addf %31, %34 : vector<64x128xf32>
    %cst_23 = arith.constant 2.000000e-01 : f32
    %36 = vector.broadcast %cst_23 : f32 to vector<64x128xf32>
    %37 = arith.mulf %36, %35 : vector<64x128xf32>
    %38 = arith.maximumf %35, %37 : vector<64x128xf32>
    %c3 = arith.constant 3 : index
    %c0_24 = arith.constant 0 : index
    %c0_25 = arith.constant 0 : index
    %39 = vector.load %arg2[%c3, %c0_24, %c0_25] : memref<8x128x128xf32, #tpu.memory_space<vmem>>, vector<1x128x128xf32>
    %40 = vector.shape_cast %39 : vector<1x128x128xf32> to vector<128x128xf32>
    %cst_26 = arith.constant dense<0.000000e+00> : vector<64x128xf32>
    %41 = tpu.matmul %38, %40, %cst_26 {dimension_numbers = #tpu.dot_dimension_numbers<[1], [0], [0], [1], [0, 0, 1, 1], [], []>} : vector<64x128xf32>, vector<128x128xf32>, vector<64x128xf32> -> vector<64x128xf32>
    %c3_27 = arith.constant 3 : index
    %c0_28 = arith.constant 0 : index
    %c0_29 = arith.constant 0 : index
    %42 = vector.load %arg3[%c3_27, %c0_28, %c0_29] : memref<8x1x128xf32, #tpu.memory_space<vmem>>, vector<1x1x128xf32>
    %43 = vector.shape_cast %42 : vector<1x1x128xf32> to vector<1x128xf32>
    %44 = vector.broadcast %43 : vector<1x128xf32> to vector<64x128xf32>
    %45 = arith.addf %41, %44 : vector<64x128xf32>
    %cst_30 = arith.constant 2.000000e-01 : f32
    %46 = vector.broadcast %cst_30 : f32 to vector<64x128xf32>
    %47 = arith.mulf %46, %45 : vector<64x128xf32>
    %48 = arith.maximumf %45, %47 : vector<64x128xf32>
    %c4 = arith.constant 4 : index
    %c0_31 = arith.constant 0 : index
    %c0_32 = arith.constant 0 : index
    %49 = vector.load %arg2[%c4, %c0_31, %c0_32] : memref<8x128x128xf32, #tpu.memory_space<vmem>>, vector<1x128x128xf32>
    %50 = vector.shape_cast %49 : vector<1x128x128xf32> to vector<128x128xf32>
    %cst_33 = arith.constant dense<0.000000e+00> : vector<64x128xf32>
    %51 = tpu.matmul %48, %50, %cst_33 {dimension_numbers = #tpu.dot_dimension_numbers<[1], [0], [0], [1], [0, 0, 1, 1], [], []>} : vector<64x128xf32>, vector<128x128xf32>, vector<64x128xf32> -> vector<64x128xf32>
    %c4_34 = arith.constant 4 : index
    %c0_35 = arith.constant 0 : index
    %c0_36 = arith.constant 0 : index
    %52 = vector.load %arg3[%c4_34, %c0_35, %c0_36] : memref<8x1x128xf32, #tpu.memory_space<vmem>>, vector<1x1x128xf32>
    %53 = vector.shape_cast %52 : vector<1x1x128xf32> to vector<1x128xf32>
    %54 = vector.broadcast %53 : vector<1x128xf32> to vector<64x128xf32>
    %55 = arith.addf %51, %54 : vector<64x128xf32>
    %cst_37 = arith.constant 2.000000e-01 : f32
    %56 = vector.broadcast %cst_37 : f32 to vector<64x128xf32>
    %57 = arith.mulf %56, %55 : vector<64x128xf32>
    %58 = arith.maximumf %55, %57 : vector<64x128xf32>
    %c5 = arith.constant 5 : index
    %c0_38 = arith.constant 0 : index
    %c0_39 = arith.constant 0 : index
    %59 = vector.load %arg2[%c5, %c0_38, %c0_39] : memref<8x128x128xf32, #tpu.memory_space<vmem>>, vector<1x128x128xf32>
    %60 = vector.shape_cast %59 : vector<1x128x128xf32> to vector<128x128xf32>
    %cst_40 = arith.constant dense<0.000000e+00> : vector<64x128xf32>
    %61 = tpu.matmul %58, %60, %cst_40 {dimension_numbers = #tpu.dot_dimension_numbers<[1], [0], [0], [1], [0, 0, 1, 1], [], []>} : vector<64x128xf32>, vector<128x128xf32>, vector<64x128xf32> -> vector<64x128xf32>
    %c5_41 = arith.constant 5 : index
    %c0_42 = arith.constant 0 : index
    %c0_43 = arith.constant 0 : index
    %62 = vector.load %arg3[%c5_41, %c0_42, %c0_43] : memref<8x1x128xf32, #tpu.memory_space<vmem>>, vector<1x1x128xf32>
    %63 = vector.shape_cast %62 : vector<1x1x128xf32> to vector<1x128xf32>
    %64 = vector.broadcast %63 : vector<1x128xf32> to vector<64x128xf32>
    %65 = arith.addf %61, %64 : vector<64x128xf32>
    %cst_44 = arith.constant 2.000000e-01 : f32
    %66 = vector.broadcast %cst_44 : f32 to vector<64x128xf32>
    %67 = arith.mulf %66, %65 : vector<64x128xf32>
    %68 = arith.maximumf %65, %67 : vector<64x128xf32>
    %c6 = arith.constant 6 : index
    %c0_45 = arith.constant 0 : index
    %c0_46 = arith.constant 0 : index
    %69 = vector.load %arg2[%c6, %c0_45, %c0_46] : memref<8x128x128xf32, #tpu.memory_space<vmem>>, vector<1x128x128xf32>
    %70 = vector.shape_cast %69 : vector<1x128x128xf32> to vector<128x128xf32>
    %cst_47 = arith.constant dense<0.000000e+00> : vector<64x128xf32>
    %71 = tpu.matmul %68, %70, %cst_47 {dimension_numbers = #tpu.dot_dimension_numbers<[1], [0], [0], [1], [0, 0, 1, 1], [], []>} : vector<64x128xf32>, vector<128x128xf32>, vector<64x128xf32> -> vector<64x128xf32>
    %c6_48 = arith.constant 6 : index
    %c0_49 = arith.constant 0 : index
    %c0_50 = arith.constant 0 : index
    %72 = vector.load %arg3[%c6_48, %c0_49, %c0_50] : memref<8x1x128xf32, #tpu.memory_space<vmem>>, vector<1x1x128xf32>
    %73 = vector.shape_cast %72 : vector<1x1x128xf32> to vector<1x128xf32>
    %74 = vector.broadcast %73 : vector<1x128xf32> to vector<64x128xf32>
    %75 = arith.addf %71, %74 : vector<64x128xf32>
    %cst_51 = arith.constant 2.000000e-01 : f32
    %76 = vector.broadcast %cst_51 : f32 to vector<64x128xf32>
    %77 = arith.mulf %76, %75 : vector<64x128xf32>
    %78 = arith.maximumf %75, %77 : vector<64x128xf32>
    %c7 = arith.constant 7 : index
    %c0_52 = arith.constant 0 : index
    %c0_53 = arith.constant 0 : index
    %79 = vector.load %arg2[%c7, %c0_52, %c0_53] : memref<8x128x128xf32, #tpu.memory_space<vmem>>, vector<1x128x128xf32>
    %80 = vector.shape_cast %79 : vector<1x128x128xf32> to vector<128x128xf32>
    %cst_54 = arith.constant dense<0.000000e+00> : vector<64x128xf32>
    %81 = tpu.matmul %78, %80, %cst_54 {dimension_numbers = #tpu.dot_dimension_numbers<[1], [0], [0], [1], [0, 0, 1, 1], [], []>} : vector<64x128xf32>, vector<128x128xf32>, vector<64x128xf32> -> vector<64x128xf32>
    %c7_55 = arith.constant 7 : index
    %c0_56 = arith.constant 0 : index
    %c0_57 = arith.constant 0 : index
    %82 = vector.load %arg3[%c7_55, %c0_56, %c0_57] : memref<8x1x128xf32, #tpu.memory_space<vmem>>, vector<1x1x128xf32>
    %83 = vector.shape_cast %82 : vector<1x1x128xf32> to vector<1x128xf32>
    %84 = vector.broadcast %83 : vector<1x128xf32> to vector<64x128xf32>
    %85 = arith.addf %81, %84 : vector<64x128xf32>
    %cst_58 = arith.constant 2.000000e-01 : f32
    %86 = vector.broadcast %cst_58 : f32 to vector<64x128xf32>
    %87 = arith.mulf %86, %85 : vector<64x128xf32>
    %88 = arith.maximumf %85, %87 : vector<64x128xf32>
    %c0_59 = arith.constant 0 : index
    %c0_60 = arith.constant 0 : index
    %89 = vector.load %arg4[%c0_59, %c0_60] : memref<64x128xf32, #tpu.memory_space<vmem>>, vector<64x128xf32>
    tpu.vector_store %arg4[%c0_59, %c0_60], %88 {strides = array<i32>} : memref<64x128xf32, #tpu.memory_space<vmem>>, vector<64x128xf32>,
    return
  }
  func.func @transform_0(%arg0: i32) -> (i32, i32) {
    %c0_i32 = arith.constant 0 : i32
    %c0_i32_0 = arith.constant 0 : i32
    return %arg0, %c0_i32 : i32, i32
  }
  func.func @transform_1(%arg0: i32) -> (i32, i32, i32) {
    %c0_i32 = arith.constant 0 : i32
    %c0_i32_0 = arith.constant 0 : i32
    %c0_i32_1 = arith.constant 0 : i32
    %c0_i32_2 = arith.constant 0 : i32
    return %c0_i32, %c0_i32_0, %c0_i32_1 : i32, i32, i32
  }
  func.func @transform_2(%arg0: i32) -> (i32, i32, i32) {
    %c0_i32 = arith.constant 0 : i32
    %c0_i32_0 = arith.constant 0 : i32
    %c0_i32_1 = arith.constant 0 : i32
    %c0_i32_2 = arith.constant 0 : i32
    return %c0_i32, %c0_i32_0, %c0_i32_1 : i32, i32, i32
  }
  func.func @transform_3(%arg0: i32) -> (i32, i32) {
    %c0_i32 = arith.constant 0 : i32
    %c0_i32_0 = arith.constant 0 : i32
    return %arg0, %c0_i32 : i32, i32
  }
}

</mosaic_0001>

<bundles_post_ra>
// kernel: tpu_custom_call.1
= control target key start
LH: loop header
LB: loop body
LE: loop exit
PB: predicated region body
PF: predicated region fallthrough
CT: control target
= control target key end

     0   :  { %8 = vsyncpa [#allocation3], 0  ;;  %s2362_s0 = inlined_call_operand.hbm [shape: f32[64,128], index: 0, kind: input, shape index: {}]   ;;  %s2363_s1 = inlined_call_operand.hbm [shape: f32[8,128,128], index: 1, kind: input, shape index: {}]   ;;  %s2364_s2 = inlined_call_operand.hbm [shape: f32[8,1,128], index: 2, kind: input, shape index: {}]   ;;  %s2365_s3 = inlined_call_operand.hbm [shape: f32[64,128], index: 3, kind: output, shape index: {}]  }
   0x1   :  { %9 = vsyncpa [#allocation6], 0 }
   0x2   :  { %10 = vsyncpa [#allocation4], 0  ;;  %s2230_s12 = smov [#allocation5]   ;;  %s2231_s14 = smov [#allocation2]  }
   0x3   :  { %s28_s13 = sshll.u32 %s2230_s12, 4  ;;  %s16_s15 = sshll.u32 %s2231_s14, 4  ;;  %s29_s13 = int_to_ptr.vmem [resolvable:$true] %s28_s13  ;;  %s2258_s15 = int_to_ptr.vmem [resolvable:$true] %s16_s15 }
   0x4   :  { %s2136_s18 = scalar_lea.hbm %s2363_s1, 16384 }
   0x5   :  { %p2137_p0 = scmp.ne.s32.totalorder %s2363_s1, %s2136_s18  ;;  %p2140_p1 = scmp.lt.u32.totalorder %s2136_s18, %s2363_s1 }
   0x7   :  { %p2142_p2 = pnand %p2140_p1, %p2137_p0 }
   0x9   :  { %2145 = shalt.err (!%p2142_p2)
}
   0xa   :  { %s2146_s23 = scalar_lea.vmem %s29_s13, 16384  ;;  %p2151_p4 = scmp.lt.s32.totalorder %s29_s13, %s29_s13 }
   0xb   :  { %p2147_p3 = scmp.ne.s32.totalorder %s29_s13, %s2146_s23  ;;  %p2152_p5 = scmp.lt.s32.totalorder %s2146_s23, %s2146_s23 }
   0xd   :  { %p2153_p6 = por %p2152_p5, %p2151_p4 }
   0xf   :  { %p2154_p7 = pnand %p2153_p6, %p2147_p3 }
  0x11   :  { %2157 = shalt.err (!%p2154_p7)
}
  0x12   :  { %s2232_s24 = smov 128   ;;  %s2233_s25 = smov 8  }
  0x13   :  { %34 = dma.hbm_to_vmem [thread:$0]  %s2363_s1, 16384, %s29_s13, [#allocation6], %s2232_s24, %s2232_s24, %s2233_s25  }
  0x14   :  { %s2158_s30 = scalar_lea.hbm %s2362_s0, 1024 }
  0x15   :  { %p2159_p8 = scmp.ne.s32.totalorder %s2362_s0, %s2158_s30  ;;  %p2162_p9 = scmp.lt.u32.totalorder %s2158_s30, %s2362_s0 }
  0x17   :  { %p2164_p10 = pnand %p2162_p9, %p2159_p8 }
  0x19   :  { %2167 = shalt.err (!%p2164_p10)
}
  0x1a   :  { %s2168_s8 = scalar_lea.vmem %s2258_s15, 1024  ;;  %p2173_p12 = scmp.lt.s32.totalorder %s2258_s15, %s2258_s15 }
  0x1b   :  { %p2169_p11 = scmp.ne.s32.totalorder %s2258_s15, %s2168_s8  ;;  %p2174_p13 = scmp.lt.s32.totalorder %s2168_s8, %s2168_s8 }
  0x1d   :  { %p2175_p0 = por %p2174_p13, %p2173_p12 }
  0x1f   :  { %p2176_p1 = pnand %p2175_p0, %p2169_p11 }
  0x21   :  { %2179 = shalt.err (!%p2176_p1)
}
  0x22   :  { %22 = dma.hbm_to_vmem [thread:$0]  %s2362_s0, 1024, %s2258_s15, [#allocation3], %s2232_s24, %s2232_s24, %s2233_s25  }
  0x23   :  { %s2234_s10 = smov [#allocation7]   ;;  %s2180_s14 = scalar_lea.hbm %s2364_s2, 128 }
  0x24   :  { %s40_s11 = sshll.u32 %s2234_s10, 4  ;;  %p2181_p2 = scmp.ne.s32.totalorder %s2364_s2, %s2180_s14  ;;  %s41_s11 = int_to_ptr.vmem [resolvable:$true] %s40_s11 }
  0x25   :  { %p2184_p3 = scmp.lt.u32.totalorder %s2180_s14, %s2364_s2 }
  0x27   :  { %p2186_p4 = pnand %p2184_p3, %p2181_p2 }
  0x29   :  { %2189 = shalt.err (!%p2186_p4)
}
  0x2a   :  { %s2190_s20 = scalar_lea.vmem %s41_s11, 128  ;;  %p2195_p6 = scmp.lt.s32.totalorder %s41_s11, %s41_s11 }
  0x2b   :  { %p2191_p5 = scmp.ne.s32.totalorder %s41_s11, %s2190_s20  ;;  %p2196_p7 = scmp.lt.s32.totalorder %s2190_s20, %s2190_s20 }
  0x2d   :  { %p2197_p8 = por %p2196_p7, %p2195_p6 }
  0x2f   :  { %p2198_p9 = pnand %p2197_p8, %p2191_p5 }
  0x31   :  { %2201 = shalt.err (!%p2198_p9)
}
  0x32   :  { %s2235_s0 = smov 16   ;;  %s2236_s15 = smov 1  }
  0x33   :  { %46 = dma.hbm_to_vmem [thread:$0]  %s2364_s2, 128, %s41_s11, [#allocation6], %s2235_s0, %s2235_s0, %s2236_s15  }
  0x34   :  { %2224 = dma.done.wait [#allocation3], 1024  }
  0x35   :  { %2225 = vsyncadd [#allocation3], 4294966272 }
  0x36   :  { %2226 = dma.done.wait [#allocation6], 16512  }
  0x37   :  { %2227 = vsyncadd [#allocation6], 4294950784  ;;  %v2307_v0 = vld [vmem:[#allocation2] sm:$0xff]  ;;  %v2309_v1 = vld [vmem:[#allocation2 + $0x10] sm:$0xff]  ;;  %s2237_s2 = smov [#allocation8]  }
  0x38   :  { %v2311_v2 = vld [vmem:[#allocation2 + $0x8] sm:$0xff]  ;;  %v64_v3 = vmul.f32 %v2307_v0, %v2307_v0  ;;  %v66_v4 = vmul.f32 %v2309_v1, %v2309_v1  ;;  %v2317_v5 = vld [vmem:[#allocation2 + $0x18] sm:$0xff]  ;;  %v112_v6 = vld [vmem:[#allocation5] sm:$0xff]  ;;  %s1291_s23 = sshll.u32 %s2237_s2, 4  ;;  %s1292_s23 = int_to_ptr.vmem [resolvable:$true] %s1291_s23 }
  0x39   :  { %v65_v7 = vmul.f32 %v2311_v2, %v2311_v2  ;;  %v67_v8 = vmul.f32 %v2317_v5, %v2317_v5  ;;  %v113_v9 = vld [vmem:[#allocation5 + $0x8] sm:$0xff]  ;;  %v114_v10 = vld [vmem:[#allocation5 + $0x10] sm:$0xff]  ;;  %v115_v11 = vld [vmem:[#allocation5 + $0x18] sm:$0xff]  ;;  %s2202_s26 = scalar_lea.vmem %s1292_s23, 1024  ;;  %p2207_p11 = scmp.lt.s32.totalorder %s1292_s23, %s1292_s23 }
  0x3a   :  { %72 = vadd.xlane.f32.xlu0 %v64_v3  ;;  %76 = vadd.xlane.f32.xlu1 %v66_v4  ;;  %v2323_v12 = vld [vmem:[#allocation2 + $0x20] sm:$0xff]  ;;  %v2325_v13 = vld [vmem:[#allocation2 + $0x28] sm:$0xff]  ;;  %v1856_v14 = vpack.c.bf16 %v113_v9, %v112_v6  ;;  %v1860_v15 = vpack.c.bf16 %v115_v11, %v114_v10  ;;  %v2331_v20 = vld [vmem:[#allocation2 + $0x30] sm:$0xff]  ;;  %p2203_p10 = scmp.ne.s32.totalorder %s1292_s23, %s2202_s26  ;;  %p2208_p12 = scmp.lt.s32.totalorder %s2202_s26, %s2202_s26 }
  0x3b   :  { %v116_v16 = vld [vmem:[#allocation5 + $0x20] sm:$0xff]  ;;  %v117_v17 = vld [vmem:[#allocation5 + $0x28] sm:$0xff]  ;;  %v68_v18 = vmul.f32 %v2323_v12, %v2323_v12  ;;  %v69_v19 = vmul.f32 %v2325_v13, %v2325_v13  ;;  %v2333_v21 = vld [vmem:[#allocation2 + $0x38] sm:$0xff]  ;;  %v70_v25 = vmul.f32 %v2331_v20, %v2331_v20 }
  0x3c   :  { %1857 = vmatprep.subr.bf16.mxu0 %v1856_v14  ;;  %v1864_v22 = vpack.c.bf16 %v117_v17, %v116_v16  ;;  %v118_v23 = vld [vmem:[#allocation5 + $0x30] sm:$0xff]  ;;  %v119_v24 = vld [vmem:[#allocation5 + $0x38] sm:$0xff]  ;;  %v71_v26 = vmul.f32 %v2333_v21, %v2333_v21  ;;  %v120_v28 = vld [vmem:[#allocation5 + $0x40] sm:$0xff]  ;;  %p2209_p13 = por %p2208_p12, %p2207_p11 }
  0x3d   :  { %1859 = vmatpush3.bf16.msra.mxu0 %v1856_v14  ;;  %v1868_v27 = vpack.c.bf16 %v119_v24, %v118_v23  ;;  %v121_v29 = vld [vmem:[#allocation5 + $0x48] sm:$0xff]  ;;  %v122_v31 = vld [vmem:[#allocation5 + $0x50] sm:$0xff]  ;;  %v123_v32 = vld [vmem:[#allocation5 + $0x58] sm:$0xff] }
  0x3e   :  { %74 = vadd.xlane.f32.xlu0 %v65_v7  ;;  %78 = vadd.xlane.f32.xlu1 %v67_v8  ;;  %v1872_v30 = vpack.c.bf16 %v121_v29, %v120_v28  ;;  %v1876_v33 = vpack.c.bf16 %v123_v32, %v122_v31  ;;  %v124_v34 = vld [vmem:[#allocation5 + $0x60] sm:$0xff]  ;;  %v125_v35 = vld [vmem:[#allocation5 + $0x68] sm:$0xff]  ;;  %v126_v37 = vld [vmem:[#allocation5 + $0x70] sm:$0xff]  ;;  %p2210_p0 = pnand %p2209_p13, %p2203_p10 }
  0x3f   :  { %1861 = vmatprep.subr.bf16.mxu0 %v1860_v15  ;;  %v1880_v36 = vpack.c.bf16 %v125_v35, %v124_v34  ;;  %v127_v38 = vld [vmem:[#allocation5 + $0x78] sm:$0xff]  ;;  %v257_v40 = vld [vmem:[#allocation5 + $0x80] sm:$0xff]  ;;  %v258_v41 = vld [vmem:[#allocation5 + $0x88] sm:$0xff] }
  0x40   :  { %v1884_v39 = vpack.c.bf16 %v127_v38, %v126_v37  ;;  %v259_v42 = vld [vmem:[#allocation5 + $0x90] sm:$0xff]  ;;  %v1888_v43 = vpack.c.bf16 %v258_v41, %v257_v40  ;;  %v260_v44 = vld [vmem:[#allocation5 + $0x98] sm:$0xff]  ;;  %v261_v46 = vld [vmem:[#allocation5 + $0xa0] sm:$0xff] }
  0x41   :  { %1863 = vmatpush3.bf16.msra.mxu0 %v1860_v15  ;;  %v1892_v45 = vpack.c.bf16 %v260_v44, %v259_v42  ;;  %v262_v47 = vld [vmem:[#allocation5 + $0xa8] sm:$0xff]  ;;  %v263_v49 = vld [vmem:[#allocation5 + $0xb0] sm:$0xff]  ;;  %v264_v50 = vld [vmem:[#allocation5 + $0xb8] sm:$0xff] }
  0x42   :  { %80 = vadd.xlane.f32.xlu0 %v68_v18  ;;  %82 = vadd.xlane.f32.xlu1 %v69_v19  ;;  %v1896_v48 = vpack.c.bf16 %v262_v47, %v261_v46  ;;  %v1900_v51 = vpack.c.bf16 %v264_v50, %v263_v49  ;;  %v265_v52 = vld [vmem:[#allocation5 + $0xc0] sm:$0xff]  ;;  %v266_v53 = vld [vmem:[#allocation5 + $0xc8] sm:$0xff]  ;;  %v267_v55 = vld [vmem:[#allocation5 + $0xd0] sm:$0xff] }
  0x43   :  { %1865 = vmatprep.subr.bf16.mxu0 %v1864_v22  ;;  %1889 = vmatprep.subr.bf16.mxu1 %v1888_v43  ;;  %v1904_v54 = vpack.c.bf16 %v266_v53, %v265_v52  ;;  %v268_v56 = vld [vmem:[#allocation5 + $0xd8] sm:$0xff]  ;;  %v404_v35 = vld [vmem:[#allocation5 + $0x108] sm:$0xff]  ;;  %v409_v41 = vld [vmem:[#allocation5 + $0x130] sm:$0xff] }
  0x44   :  { %1891 = vmatpush3.bf16.msra.mxu1 %v1888_v43  ;;  %v1908_v57 = vpack.c.bf16 %v268_v56, %v267_v55  ;;  %v410_v42 = vld [vmem:[#allocation5 + $0x138] sm:$0xff]  ;;  %v411_v44 = vld [vmem:[#allocation5 + $0x140] sm:$0xff]  ;;  %v413_v47 = vld [vmem:[#allocation5 + $0x150] sm:$0xff] }
  0x45   :  { %1867 = vmatpush3.bf16.msra.mxu0 %v1864_v22  ;;  %1893 = vmatprep.subr.bf16.mxu1 %v1892_v45  ;;  %v1932_v43 = vpack.c.bf16 %v410_v42, %v409_v41  ;;  %v1304_v50 = vld [vmem:[#allocation7] ss:$0 sm:$0xff]  ;;  %v560_v41 = vld [vmem:[#allocation5 + $0x1d8] sm:$0xff] }
  0x46   :  { %84 = vadd.xlane.f32.xlu0 %v70_v25  ;;  %86 = vadd.xlane.f32.xlu1 %v71_v26 }
  0x47   :  { %1869 = vmatprep.subr.bf16.mxu0 %v1868_v27 }
  0x48   :  { %1895 = vmatpush3.bf16.msra.mxu1 %v1892_v45  ;;  %v412_v45 = vld [vmem:[#allocation5 + $0x148] sm:$0xff] }
  0x49   :  { %1871 = vmatpush3.bf16.msra.mxu0 %v1868_v27  ;;  %1897 = vmatprep.subr.bf16.mxu1 %v1896_v48  ;;  %v1936_v46 = vpack.c.bf16 %v412_v45, %v411_v44 }
  0x4a   :  { %1873 = vmatprep.subr.bf16.mxu0 %v1872_v30 }
  0x4c   :  { %1899 = vmatpush3.bf16.msra.mxu1 %v1896_v48  ;;  %v414_v48 = vld [vmem:[#allocation5 + $0x158] sm:$0xff] }
  0x4d   :  { %1875 = vmatpush3.bf16.msra.mxu0 %v1872_v30  ;;  %1901 = vmatprep.subr.bf16.mxu1 %v1900_v51  ;;  %v1940_v49 = vpack.c.bf16 %v414_v48, %v413_v47 }
  0x4e   :  { %1877 = vmatprep.subr.bf16.mxu0 %v1876_v33 }
  0x50   :  { %1903 = vmatpush3.bf16.msra.mxu1 %v1900_v51 }
  0x51   :  { %1879 = vmatpush3.bf16.msra.mxu0 %v1876_v33  ;;  %1905 = vmatprep.subr.bf16.mxu1 %v1904_v54  ;;  %v271_v33 = vld [vmem:[#allocation5 + $0xf0] sm:$0xff] }
  0x52   :  { %1881 = vmatprep.subr.bf16.mxu0 %v1880_v36 }
  0x54   :  { %1907 = vmatpush3.bf16.msra.mxu1 %v1904_v54 }
  0x55   :  { %1883 = vmatpush3.bf16.msra.mxu0 %v1880_v36  ;;  %1909 = vmatprep.subr.bf16.mxu1 %v1908_v57  ;;  %v405_v36 = vld [vmem:[#allocation5 + $0x110] sm:$0xff] }
  0x56   :  { %1885 = vmatprep.subr.bf16.mxu0 %v1884_v39 }
  0x58   :  { %1911 = vmatpush3.bf16.msra.mxu1 %v1908_v57 }
  0x59   :  { %1887 = vmatpush3.bf16.msra.mxu0 %v1884_v39  ;;  %v407_v39 = vld [vmem:[#allocation5 + $0x120] sm:$0xff] }
  0xc7   :  { %v73_v58 = vpop.xlane.xlu0 %72  ;;  %v77_v59 = vpop.xlane.xlu1 %76 }
  0xc8   :  { %v88_v60 = vmax.f32 %v73_v58, 1e-24  ;;  %v90_v61 = vmax.f32 %v77_v59, 1e-24 }
  0xca   :  { %2120 = vrsqrt.f32 %v88_v60 }
  0xcb   :  { %2122 = vrsqrt.f32 %v90_v61  ;;  %v75_v62 = vpop.xlane.xlu0 %74  ;;  %v79_v63 = vpop.xlane.xlu1 %78 }
  0xcc   :  { %v89_v3 = vmax.f32 %v75_v62, 1e-24  ;;  %v91_v4 = vmax.f32 %v79_v63, 1e-24 }
  0xce   :  { %2124 = vrsqrt.f32 %v89_v3 }
  0xcf   :  { %2126 = vrsqrt.f32 %v91_v4  ;;  %v81_v6 = vpop.xlane.xlu0 %80  ;;  %v83_v7 = vpop.xlane.xlu1 %82 }
  0xd0   :  { %v92_v8 = vmax.f32 %v81_v6, 1e-24  ;;  %v93_v9 = vmax.f32 %v83_v7, 1e-24 }
  0xd2   :  { %2128 = vrsqrt.f32 %v92_v8 }
  0xd3   :  { %2130 = vrsqrt.f32 %v93_v9  ;;  %v85_v10 = vpop.xlane.xlu0 %84  ;;  %v87_v11 = vpop.xlane.xlu1 %86 }
  0xd4   :  { %v2121_v14 = vpop.eup %2120  ;;  %v94_v15 = vmax.f32 %v85_v10, 1e-24  ;;  %v95_v16 = vmax.f32 %v87_v11, 1e-24 }
  0xd5   :  { %v2123_v17 = vpop.eup %2122  ;;  %v104_v18 = vmul.f32 %v2121_v14, %v2307_v0 }
  0xd6   :  { %2132 = vrsqrt.f32 %v94_v15  ;;  %v106_v22 = vmul.f32 %v2123_v17, %v2309_v1 }
  0xd7   :  { %2134 = vrsqrt.f32 %v95_v16  ;;  %1536 = vmatprep.mubr.f32.mxu0 %v104_v18 }
  0xd8   :  { %v2125_v19 = vpop.eup %2124 }
  0xd9   :  { %v2127_v23 = vpop.eup %2126  ;;  %v105_v24 = vmul.f32 %v2125_v19, %v2311_v2  ;;  %v269_v2 = vld [vmem:[#allocation5 + $0xe0] sm:$0xff] }
  0xda   :  { %v107_v25 = vmul.f32 %v2127_v23, %v2317_v5  ;;  %v270_v5 = vld [vmem:[#allocation5 + $0xe8] sm:$0xff] }
  0xdb   :  { %1537 = vmatmul.mubr.f32.vlgmr.msra.gmra.mrb[0].mxu0 %v105_v24  ;;  %v1912_v32 = vpack.c.bf16 %v270_v5, %v269_v2  ;;  %v550_v2 = vld [vmem:[#allocation5 + $0x188] sm:$0xff]  ;;  %v551_v5 = vld [vmem:[#allocation5 + $0x190] sm:$0xff] }
  0xdc   :  { %v2129_v26 = vpop.eup %2128  ;;  %1539 = vmatprep.mubr.f32.mxu0 %v106_v22 }
  0xdd   :  { %v2131_v27 = vpop.eup %2130  ;;  %v108_v28 = vmul.f32 %v2129_v26, %v2323_v12  ;;  %1913 = vmatprep.subr.bf16.mxu1 %v1912_v32  ;;  %v272_v12 = vld [vmem:[#allocation5 + $0xf8] sm:$0xff] }
  0xde   :  { %v109_v0 = vmul.f32 %v2131_v27, %v2325_v13  ;;  %1915 = vmatpush3.bf16.msra.mxu1 %v1912_v32  ;;  %v1916_v34 = vpack.c.bf16 %v272_v12, %v271_v33  ;;  %v403_v13 = vld [vmem:[#allocation5 + $0x100] sm:$0xff]  ;;  %v552_v33 = vld [vmem:[#allocation5 + $0x198] sm:$0xff] }
  0xdf   :  { %1540 = vmatmul.mubr.f32.gmra.mrb[2].mxu0 %v107_v25  ;;  %v1920_v37 = vpack.c.bf16 %v404_v35, %v403_v13  ;;  %v415_v27 = vld [vmem:[#allocation5 + $0x160] sm:$0xff]  ;;  %v1956_v12 = vpack.c.bf16 %v552_v33, %v551_v5  ;;  %v554_v13 = vld [vmem:[#allocation5 + $0x1a8] sm:$0xff]  ;;  %v701_v5 = vld [vmem:[#allocation5 + $0x230] sm:$0xff] }
  0xe0   :  { %v2133_v29 = vpop.eup %2132  ;;  %1542 = vmatprep.mubr.f32.mxu0 %v108_v28  ;;  %1917 = vmatprep.subr.bf16.mxu1 %v1916_v34  ;;  %v416_v28 = vld [vmem:[#allocation5 + $0x168] sm:$0xff] }
  0xe1   :  { %v2135_v30 = vpop.eup %2134  ;;  %v110_v31 = vmul.f32 %v2133_v29, %v2331_v20  ;;  %v406_v20 = vld [vmem:[#allocation5 + $0x118] sm:$0xff]  ;;  %1921 = vmatprep.subr.bf16.mxu0 %v1920_v37  ;;  %v417_v29 = vld [vmem:[#allocation5 + $0x170] sm:$0xff] }
  0xe2   :  { %v111_v1 = vmul.f32 %v2135_v30, %v2333_v21  ;;  %1919 = vmatpush3.bf16.msra.mxu1 %v1916_v34  ;;  %v1924_v38 = vpack.c.bf16 %v406_v20, %v405_v36  ;;  %v408_v21 = vld [vmem:[#allocation5 + $0x128] sm:$0xff]  ;;  %1923 = vmatpush3.bf16.msra.mxu0 %v1920_v37  ;;  %v418_v30 = vld [vmem:[#allocation5 + $0x178] sm:$0xff]  ;;  %v553_v34 = vld [vmem:[#allocation5 + $0x1a0] sm:$0xff] }
  0xe3   :  { %1543 = vmatmul.mubr.f32.gmra.mrb[4].mxu0 %v109_v0  ;;  %v1928_v40 = vpack.c.bf16 %v408_v21, %v407_v39  ;;  %v1944_v0 = vpack.c.bf16 %v416_v28, %v415_v27  ;;  %v1960_v35 = vpack.c.bf16 %v554_v13, %v553_v34  ;;  %v555_v36 = vld [vmem:[#allocation5 + $0x1b0] sm:$0xff]  ;;  %v556_v37 = vld [vmem:[#allocation5 + $0x1b8] sm:$0xff]  ;;  %v558_v39 = vld [vmem:[#allocation5 + $0x1c8] sm:$0xff] }
  0xe4   :  { %1545 = vmatprep.mubr.f32.mxu0 %v110_v31  ;;  %1925 = vmatprep.subr.bf16.mxu0 %v1924_v38  ;;  %v1948_v31 = vpack.c.bf16 %v418_v30, %v417_v29  ;;  %v1964_v20 = vpack.c.bf16 %v556_v37, %v555_v36  ;;  %v696_v27 = vld [vmem:[#allocation5 + $0x208] sm:$0xff]  ;;  %v697_v28 = vld [vmem:[#allocation5 + $0x210] sm:$0xff]  ;;  %v698_v29 = vld [vmem:[#allocation5 + $0x218] sm:$0xff] }
  0xe5   :  { %v1988_v30 = vpack.c.bf16 %v698_v29, %v697_v28  ;;  %v704_v34 = vld [vmem:[#allocation5 + $0x248] sm:$0xff]  ;;  %v706_v36 = vld [vmem:[#allocation5 + $0x258] sm:$0xff]  ;;  %v847_v28 = vld [vmem:[#allocation5 + $0x2b0] sm:$0xff] }
  0xe6   :  { %1927 = vmatpush3.bf16.msra.mxu0 %v1924_v38  ;;  %v557_v38 = vld [vmem:[#allocation5 + $0x1c0] sm:$0xff] }
  0xe7   :  { %1546 = vmatmul.mubr.f32.gmra.mrb[6].mxu0 %v111_v1  ;;  %1929 = vmatprep.subr.bf16.mxu0 %v1928_v40  ;;  %v549_v1 = vld [vmem:[#allocation5 + $0x180] sm:$0xff]  ;;  %v1968_v21 = vpack.c.bf16 %v558_v39, %v557_v38 }
  0xe8   :  { %v1952_v32 = vpack.c.bf16 %v550_v2, %v549_v1  ;;  %v700_v1 = vld [vmem:[#allocation5 + $0x228] sm:$0xff] }
  0xea   :  { %1931 = vmatpush3.bf16.msra.mxu0 %v1928_v40  ;;  %1953 = vmatprep.subr.bf16.mxu1 %v1952_v32  ;;  %v559_v40 = vld [vmem:[#allocation5 + $0x1d0] sm:$0xff] }
  0xeb   :  { %1933 = vmatprep.subr.bf16.mxu0 %v1932_v43  ;;  %v1972_v42 = vpack.c.bf16 %v560_v41, %v559_v40 }
  0xee   :  { %1935 = vmatpush3.bf16.msra.mxu0 %v1932_v43  ;;  %v1305_v43 = vld [vmem:[#allocation7 + $0x1] ss:$0 sm:$0xff] }
  0xef   :  { %1937 = vmatprep.subr.bf16.mxu0 %v1936_v46 }
  0xf2   :  { %1939 = vmatpush3.bf16.msra.mxu0 %v1936_v46 }
  0xf3   :  { %1941 = vmatprep.subr.bf16.mxu0 %v1940_v49 }
  0xf6   :  { %1943 = vmatpush3.bf16.msra.mxu0 %v1940_v49 }
  0xf7   :  { %1945 = vmatprep.subr.bf16.mxu0 %v1944_v0 }
  0xfa   :  { %1947 = vmatpush3.bf16.msra.mxu0 %v1944_v0 }
  0xfb   :  { %1949 = vmatprep.subr.bf16.mxu0 %v1948_v31 }
  0xfe   :  { %1951 = vmatpush3.bf16.msra.mxu0 %v1948_v31  ;;  %v699_v31 = vld [vmem:[#allocation5 + $0x220] sm:$0xff] }
  0xff   :  { %v1992_v2 = vpack.c.bf16 %v700_v1, %v699_v31  ;;  %v850_v31 = vld [vmem:[#allocation5 + $0x2c8] sm:$0xff] }
 0x1ae   :  { %v1538_v51 = vpop.f32.mrb[0].mxu0 }
 0x1af   :  { %v207_v52 = vadd.f32 %v1538_v51, %v1304_v50  ;;  %v201_v53 = vpop.f32.mrb[1].mxu0 }
 0x1b0   :  { %v202_v54 = vadd.f32 %v1304_v50, %v201_v53 }
 0x1b1   :  { %v241_v55 = vmul.f32 0.2, %v207_v52 }
 0x1b2   :  { %v1541_v56 = vpop.f32.mrb[2].mxu0  ;;  %v240_v57 = vmul.f32 0.2, %v202_v54 }
 0x1b3   :  { %v217_v58 = vadd.f32 %v1541_v56, %v1304_v50  ;;  %v211_v59 = vpop.f32.mrb[3].mxu0  ;;  %v249_v62 = vmax.f32 %v207_v52, %v241_v55 }
 0x1b4   :  { %v212_v60 = vadd.f32 %v1304_v50, %v211_v59  ;;  %v248_v61 = vmax.f32 %v202_v54, %v240_v57 }
 0x1b5   :  { %v243_v63 = vmul.f32 0.2, %v217_v58 }
 0x1b6   :  { %v242_v3 = vmul.f32 0.2, %v212_v60  ;;  %v1544_v4 = vpop.f32.mrb[4].mxu0  ;;  %1580 = vmatprep.mubr.f32.mxu1 %v248_v61 }
 0x1b7   :  { %v227_v6 = vadd.f32 %v1544_v4, %v1304_v50  ;;  %v221_v7 = vpop.f32.mrb[5].mxu0  ;;  %1581 = vmatmul.mubr.f32.vlgmr.msra.gmra.mrb[0].mxu1 %v249_v62  ;;  %v251_v10 = vmax.f32 %v217_v58, %v243_v63 }
 0x1b8   :  { %v250_v8 = vmax.f32 %v212_v60, %v242_v3  ;;  %v222_v9 = vadd.f32 %v1304_v50, %v221_v7  ;;  %1955 = vmatpush3.bf16.msra.mxu1 %v1952_v32  ;;  %v702_v32 = vld [vmem:[#allocation5 + $0x238] sm:$0xff] }
 0x1b9   :  { %v245_v11 = vmul.f32 0.2, %v227_v6  ;;  %1957 = vmatprep.subr.bf16.mxu1 %v1956_v12  ;;  %v1996_v33 = vpack.c.bf16 %v702_v32, %v701_v5  ;;  %v852_v5 = vld [vmem:[#allocation5 + $0x2d8] sm:$0xff] }
 0x1ba   :  { %v244_v14 = vmul.f32 0.2, %v222_v9  ;;  %v1547_v15 = vpop.f32.mrb[6].mxu0  ;;  %1583 = vmatprep.mubr.f32.mxu1 %v250_v8 }
 0x1bb   :  { %v237_v16 = vadd.f32 %v1547_v15, %v1304_v50  ;;  %v231_v17 = vpop.f32.mrb[7].mxu0  ;;  %1584 = vmatmul.mubr.f32.gmra.mrb[2].mxu1 %v251_v10  ;;  %v253_v22 = vmax.f32 %v227_v6, %v245_v11 }
 0x1bc   :  { %v252_v18 = vmax.f32 %v222_v9, %v244_v14  ;;  %v232_v19 = vadd.f32 %v1304_v50, %v231_v17  ;;  %1959 = vmatpush3.bf16.msra.mxu1 %v1956_v12  ;;  %v703_v12 = vld [vmem:[#allocation5 + $0x240] sm:$0xff] }
 0x1bd   :  { %v247_v23 = vmul.f32 0.2, %v237_v16  ;;  %1961 = vmatprep.subr.bf16.mxu1 %v1960_v35  ;;  %v2000_v13 = vpack.c.bf16 %v704_v34, %v703_v12 }
 0x1be   :  { %v246_v24 = vmul.f32 0.2, %v232_v19  ;;  %1586 = vmatprep.mubr.f32.mxu1 %v252_v18  ;;  %v561_v18 = vld [vmem:[#allocation5 + $0x1e0] sm:$0xff] }
 0x1bf   :  { %1587 = vmatmul.mubr.f32.gmra.mrb[4].mxu1 %v253_v22  ;;  %v255_v26 = vmax.f32 %v237_v16, %v247_v23  ;;  %v563_v23 = vld [vmem:[#allocation5 + $0x1f0] sm:$0xff] }
 0x1c0   :  { %v254_v25 = vmax.f32 %v232_v19, %v246_v24  ;;  %1963 = vmatpush3.bf16.msra.mxu1 %v1960_v35  ;;  %v562_v19 = vld [vmem:[#allocation5 + $0x1e8] sm:$0xff]  ;;  %v564_v24 = vld [vmem:[#allocation5 + $0x1f8] sm:$0xff]  ;;  %v705_v35 = vld [vmem:[#allocation5 + $0x250] sm:$0xff] }
 0x1c1   :  { %1965 = vmatprep.subr.bf16.mxu1 %v1964_v20  ;;  %v1976_v22 = vpack.c.bf16 %v562_v19, %v561_v18  ;;  %v2004_v37 = vpack.c.bf16 %v706_v36, %v705_v35  ;;  %v842_v18 = vld [vmem:[#allocation5 + $0x288] sm:$0xff]  ;;  %v843_v19 = vld [vmem:[#allocation5 + $0x290] sm:$0xff] }
 0x1c2   :  { %1589 = vmatprep.mubr.f32.mxu1 %v254_v25  ;;  %v1980_v25 = vpack.c.bf16 %v564_v24, %v563_v23  ;;  %v844_v23 = vld [vmem:[#allocation5 + $0x298] sm:$0xff] }
 0x1c3   :  { %1590 = vmatmul.mubr.f32.gmra.mrb[6].mxu1 %v255_v26  ;;  %v695_v26 = vld [vmem:[#allocation5 + $0x200] sm:$0xff]  ;;  %v2020_v24 = vpack.c.bf16 %v844_v23, %v843_v19  ;;  %v993_v19 = vld [vmem:[#allocation5 + $0x330] sm:$0xff] }
 0x1c4   :  { %1967 = vmatpush3.bf16.msra.mxu1 %v1964_v20  ;;  %v1984_v0 = vpack.c.bf16 %v696_v27, %v695_v26  ;;  %v1306_v20 = vld [vmem:[#allocation7 + $0x2] ss:$0 sm:$0xff]  ;;  %v846_v26 = vld [vmem:[#allocation5 + $0x2a8] sm:$0xff] }
 0x1c5   :  { %1969 = vmatprep.subr.bf16.mxu1 %v1968_v21 }
 0x1c6   :  { %1985 = vmatprep.subr.bf16.mxu0 %v1984_v0 }
 0x1c8   :  { %1971 = vmatpush3.bf16.msra.mxu1 %v1968_v21 }
 0x1c9   :  { %1973 = vmatprep.subr.bf16.mxu1 %v1972_v42 }
 0x1cc   :  { %1975 = vmatpush3.bf16.msra.mxu1 %v1972_v42 }
 0x1cd   :  { %1977 = vmatprep.subr.bf16.mxu1 %v1976_v22 }
 0x1d0   :  { %1979 = vmatpush3.bf16.msra.mxu1 %v1976_v22 }
 0x1d1   :  { %1981 = vmatprep.subr.bf16.mxu1 %v1980_v25 }
 0x1d4   :  { %1983 = vmatpush3.bf16.msra.mxu1 %v1980_v25  ;;  %v845_v25 = vld [vmem:[#allocation5 + $0x2a0] sm:$0xff] }
 0x1d5   :  { %v2024_v27 = vpack.c.bf16 %v846_v26, %v845_v25  ;;  %v996_v25 = vld [vmem:[#allocation5 + $0x348] sm:$0xff] }
 0x28a   :  { %v1582_v44 = vpop.f32.mrb[0].mxu1 }
 0x28b   :  { %v353_v45 = vadd.f32 %v1582_v44, %v1305_v43  ;;  %v347_v46 = vpop.f32.mrb[1].mxu1 }
 0x28c   :  { %v348_v47 = vadd.f32 %v1305_v43, %v347_v46 }
 0x28d   :  { %v387_v48 = vmul.f32 0.2, %v353_v45 }
 0x28e   :  { %v386_v49 = vmul.f32 0.2, %v348_v47  ;;  %v1585_v50 = vpop.f32.mrb[2].mxu1 }
 0x28f   :  { %v363_v51 = vadd.f32 %v1585_v50, %v1305_v43  ;;  %v357_v52 = vpop.f32.mrb[3].mxu1  ;;  %v395_v55 = vmax.f32 %v353_v45, %v387_v48 }
 0x290   :  { %v394_v53 = vmax.f32 %v348_v47, %v386_v49  ;;  %v358_v54 = vadd.f32 %v1305_v43, %v357_v52 }
 0x291   :  { %v389_v56 = vmul.f32 0.2, %v363_v51 }
 0x292   :  { %v388_v57 = vmul.f32 0.2, %v358_v54  ;;  %v1588_v58 = vpop.f32.mrb[4].mxu1  ;;  %1624 = vmatprep.mubr.f32.mxu0 %v394_v53 }
 0x293   :  { %v373_v59 = vadd.f32 %v1588_v58, %v1305_v43  ;;  %v367_v60 = vpop.f32.mrb[5].mxu1  ;;  %1625 = vmatmul.mubr.f32.vlgmr.msra.gmra.mrb[8].mxu0 %v395_v55  ;;  %v397_v63 = vmax.f32 %v363_v51, %v389_v56 }
 0x294   :  { %v396_v61 = vmax.f32 %v358_v54, %v388_v57  ;;  %v368_v62 = vadd.f32 %v1305_v43, %v367_v60  ;;  %1987 = vmatpush3.bf16.msra.mxu0 %v1984_v0  ;;  %v848_v0 = vld [vmem:[#allocation5 + $0x2b8] sm:$0xff] }
 0x295   :  { %v391_v3 = vmul.f32 0.2, %v373_v59  ;;  %1989 = vmatprep.subr.bf16.mxu0 %v1988_v30  ;;  %v2028_v29 = vpack.c.bf16 %v848_v0, %v847_v28  ;;  %v998_v28 = vld [vmem:[#allocation5 + $0x358] sm:$0xff] }
 0x296   :  { %v390_v4 = vmul.f32 0.2, %v368_v62  ;;  %v1591_v6 = vpop.f32.mrb[6].mxu1  ;;  %1627 = vmatprep.mubr.f32.mxu0 %v396_v61 }
 0x297   :  { %v383_v7 = vadd.f32 %v1591_v6, %v1305_v43  ;;  %v377_v8 = vpop.f32.mrb[7].mxu1  ;;  %1628 = vmatmul.mubr.f32.gmra.mrb[10].mxu0 %v397_v63  ;;  %v399_v11 = vmax.f32 %v373_v59, %v391_v3 }
 0x298   :  { %v398_v9 = vmax.f32 %v368_v62, %v390_v4  ;;  %v378_v10 = vadd.f32 %v1305_v43, %v377_v8  ;;  %1991 = vmatpush3.bf16.msra.mxu0 %v1988_v30  ;;  %v849_v30 = vld [vmem:[#allocation5 + $0x2c0] sm:$0xff] }
 0x299   :  { %v393_v14 = vmul.f32 0.2, %v383_v7  ;;  %1993 = vmatprep.subr.bf16.mxu0 %v1992_v2  ;;  %v2032_v1 = vpack.c.bf16 %v850_v31, %v849_v30 }
 0x29a   :  { %v392_v15 = vmul.f32 0.2, %v378_v10  ;;  %1630 = vmatprep.mubr.f32.mxu0 %v398_v9  ;;  %v707_v9 = vld [vmem:[#allocation5 + $0x260] sm:$0xff] }
 0x29b   :  { %1631 = vmatmul.mubr.f32.gmra.mrb[12].mxu0 %v399_v11  ;;  %v401_v17 = vmax.f32 %v383_v7, %v393_v14  ;;  %v709_v14 = vld [vmem:[#allocation5 + $0x270] sm:$0xff] }
 0x29c   :  { %v400_v16 = vmax.f32 %v378_v10, %v392_v15  ;;  %1995 = vmatpush3.bf16.msra.mxu0 %v1992_v2  ;;  %v708_v10 = vld [vmem:[#allocation5 + $0x268] sm:$0xff]  ;;  %v710_v15 = vld [vmem:[#allocation5 + $0x278] sm:$0xff]  ;;  %v851_v2 = vld [vmem:[#allocation5 + $0x2d0] sm:$0xff] }
 0x29d   :  { %1997 = vmatprep.subr.bf16.mxu0 %v1996_v33  ;;  %v2008_v11 = vpack.c.bf16 %v708_v10, %v707_v9  ;;  %v2036_v32 = vpack.c.bf16 %v852_v5, %v851_v2  ;;  %v988_v9 = vld [vmem:[#allocation5 + $0x308] sm:$0xff]  ;;  %v989_v10 = vld [vmem:[#allocation5 + $0x310] sm:$0xff] }
 0x29e   :  { %1633 = vmatprep.mubr.f32.mxu0 %v400_v16  ;;  %v2012_v16 = vpack.c.bf16 %v710_v15, %v709_v14  ;;  %v990_v14 = vld [vmem:[#allocation5 + $0x318] sm:$0xff] }
 0x29f   :  { %1634 = vmatmul.mubr.f32.gmra.mrb[14].mxu0 %v401_v17  ;;  %v841_v17 = vld [vmem:[#allocation5 + $0x280] sm:$0xff]  ;;  %v2052_v15 = vpack.c.bf16 %v990_v14, %v989_v10  ;;  %v1139_v10 = vld [vmem:[#allocation5 + $0x3b0] sm:$0xff] }
 0x2a0   :  { %1999 = vmatpush3.bf16.msra.mxu0 %v1996_v33  ;;  %v2016_v22 = vpack.c.bf16 %v842_v18, %v841_v17  ;;  %v1307_v33 = vld [vmem:[#allocation7 + $0x3] ss:$0 sm:$0xff]  ;;  %v992_v17 = vld [vmem:[#allocation5 + $0x328] sm:$0xff] }
 0x2a1   :  { %2001 = vmatprep.subr.bf16.mxu0 %v2000_v13 }
 0x2a2   :  { %2017 = vmatprep.subr.bf16.mxu1 %v2016_v22 }
 0x2a4   :  { %2003 = vmatpush3.bf16.msra.mxu0 %v2000_v13 }
 0x2a5   :  { %2005 = vmatprep.subr.bf16.mxu0 %v2004_v37 }
 0x2a8   :  { %2007 = vmatpush3.bf16.msra.mxu0 %v2004_v37 }
 0x2a9   :  { %2009 = vmatprep.subr.bf16.mxu0 %v2008_v11 }
 0x2ac   :  { %2011 = vmatpush3.bf16.msra.mxu0 %v2008_v11 }
 0x2ad   :  { %2013 = vmatprep.subr.bf16.mxu0 %v2012_v16 }
 0x2b0   :  { %2015 = vmatpush3.bf16.msra.mxu0 %v2012_v16  ;;  %v991_v16 = vld [vmem:[#allocation5 + $0x320] sm:$0xff] }
 0x2b1   :  { %v2056_v18 = vpack.c.bf16 %v992_v17, %v991_v16  ;;  %v1142_v16 = vld [vmem:[#allocation5 + $0x3c8] sm:$0xff] }
 0x366   :  { %v1626_v38 = vpop.f32.mrb[8].mxu0 }
 0x367   :  { %v499_v39 = vadd.f32 %v1626_v38, %v1306_v20  ;;  %v493_v21 = vpop.f32.mrb[9].mxu0 }
 0x368   :  { %v494_v40 = vadd.f32 %v1306_v20, %v493_v21 }
 0x369   :  { %v533_v41 = vmul.f32 0.2, %v499_v39 }
 0x36a   :  { %v532_v42 = vmul.f32 0.2, %v494_v40  ;;  %v1629_v43 = vpop.f32.mrb[10].mxu0 }
 0x36b   :  { %v509_v44 = vadd.f32 %v1629_v43, %v1306_v20  ;;  %v503_v45 = vpop.f32.mrb[11].mxu0  ;;  %v541_v48 = vmax.f32 %v499_v39, %v533_v41 }
 0x36c   :  { %v540_v46 = vmax.f32 %v494_v40, %v532_v42  ;;  %v504_v47 = vadd.f32 %v1306_v20, %v503_v45 }
 0x36d   :  { %v535_v49 = vmul.f32 0.2, %v509_v44 }
 0x36e   :  { %v534_v50 = vmul.f32 0.2, %v504_v47  ;;  %v1632_v51 = vpop.f32.mrb[12].mxu0  ;;  %1668 = vmatprep.mubr.f32.mxu1 %v540_v46 }
 0x36f   :  { %v519_v52 = vadd.f32 %v1632_v51, %v1306_v20  ;;  %v513_v53 = vpop.f32.mrb[13].mxu0  ;;  %1669 = vmatmul.mubr.f32.vlgmr.msra.gmra.mrb[8].mxu1 %v541_v48  ;;  %v543_v56 = vmax.f32 %v509_v44, %v535_v49 }
 0x370   :  { %v542_v54 = vmax.f32 %v504_v47, %v534_v50  ;;  %v514_v55 = vadd.f32 %v1306_v20, %v513_v53  ;;  %2019 = vmatpush3.bf16.msra.mxu1 %v2016_v22  ;;  %v994_v22 = vld [vmem:[#allocation5 + $0x338] sm:$0xff] }
 0x371   :  { %v537_v57 = vmul.f32 0.2, %v519_v52  ;;  %2021 = vmatprep.subr.bf16.mxu1 %v2020_v24  ;;  %v2060_v23 = vpack.c.bf16 %v994_v22, %v993_v19  ;;  %v1144_v19 = vld [vmem:[#allocation5 + $0x3d8] sm:$0xff] }
 0x372   :  { %v536_v58 = vmul.f32 0.2, %v514_v55  ;;  %v1635_v59 = vpop.f32.mrb[14].mxu0  ;;  %1671 = vmatprep.mubr.f32.mxu1 %v542_v54 }
 0x373   :  { %v529_v60 = vadd.f32 %v1635_v59, %v1306_v20  ;;  %v523_v61 = vpop.f32.mrb[15].mxu0  ;;  %1672 = vmatmul.mubr.f32.gmra.mrb[10].mxu1 %v543_v56  ;;  %v545_v3 = vmax.f32 %v519_v52, %v537_v57 }
 0x374   :  { %v544_v62 = vmax.f32 %v514_v55, %v536_v58  ;;  %v524_v63 = vadd.f32 %v1306_v20, %v523_v61  ;;  %2023 = vmatpush3.bf16.msra.mxu1 %v2020_v24  ;;  %v995_v24 = vld [vmem:[#allocation5 + $0x340] sm:$0xff] }
 0x375   :  { %v539_v4 = vmul.f32 0.2, %v529_v60  ;;  %2025 = vmatprep.subr.bf16.mxu1 %v2024_v27  ;;  %v2064_v26 = vpack.c.bf16 %v996_v25, %v995_v24 }
 0x376   :  { %v538_v6 = vmul.f32 0.2, %v524_v63  ;;  %1674 = vmatprep.mubr.f32.mxu1 %v544_v62  ;;  %v853_v62 = vld [vmem:[#allocation5 + $0x2e0] sm:$0xff] }
 0x377   :  { %1675 = vmatmul.mubr.f32.gmra.mrb[12].mxu1 %v545_v3  ;;  %v547_v8 = vmax.f32 %v529_v60, %v539_v4  ;;  %v855_v4 = vld [vmem:[#allocation5 + $0x2f0] sm:$0xff] }
 0x378   :  { %v546_v7 = vmax.f32 %v524_v63, %v538_v6  ;;  %2027 = vmatpush3.bf16.msra.mxu1 %v2024_v27  ;;  %v854_v63 = vld [vmem:[#allocation5 + $0x2e8] sm:$0xff]  ;;  %v856_v6 = vld [vmem:[#allocation5 + $0x2f8] sm:$0xff]  ;;  %v997_v27 = vld [vmem:[#allocation5 + $0x350] sm:$0xff] }
 0x379   :  { %2029 = vmatprep.subr.bf16.mxu1 %v2028_v29  ;;  %v2040_v3 = vpack.c.bf16 %v854_v63, %v853_v62  ;;  %v2068_v0 = vpack.c.bf16 %v998_v28, %v997_v27  ;;  %v1134_v62 = vld [vmem:[#allocation5 + $0x388] sm:$0xff]  ;;  %v1135_v63 = vld [vmem:[#allocation5 + $0x390] sm:$0xff] }
 0x37a   :  { %1677 = vmatprep.mubr.f32.mxu1 %v546_v7  ;;  %v2044_v7 = vpack.c.bf16 %v856_v6, %v855_v4  ;;  %v1136_v4 = vld [vmem:[#allocation5 + $0x398] sm:$0xff] }
 0x37b   :  { %1678 = vmatmul.mubr.f32.gmra.mrb[14].mxu1 %v547_v8  ;;  %v987_v8 = vld [vmem:[#allocation5 + $0x300] sm:$0xff]  ;;  %v2084_v6 = vpack.c.bf16 %v1136_v4, %v1135_v63 }
 0x37c   :  { %2031 = vmatpush3.bf16.msra.mxu1 %v2028_v29  ;;  %v2048_v11 = vpack.c.bf16 %v988_v9, %v987_v8  ;;  %v1308_v29 = vld [vmem:[#allocation7 + $0x4] ss:$0 sm:$0xff]  ;;  %v1138_v8 = vld [vmem:[#allocation5 + $0x3a8] sm:$0xff] }
 0x37d   :  { %2033 = vmatprep.subr.bf16.mxu1 %v2032_v1 }
 0x37e   :  { %2049 = vmatprep.subr.bf16.mxu0 %v2048_v11 }
 0x380   :  { %2035 = vmatpush3.bf16.msra.mxu1 %v2032_v1 }
 0x381   :  { %2037 = vmatprep.subr.bf16.mxu1 %v2036_v32 }
 0x384   :  { %2039 = vmatpush3.bf16.msra.mxu1 %v2036_v32 }
 0x385   :  { %2041 = vmatprep.subr.bf16.mxu1 %v2040_v3 }
 0x388   :  { %2043 = vmatpush3.bf16.msra.mxu1 %v2040_v3 }
 0x389   :  { %2045 = vmatprep.subr.bf16.mxu1 %v2044_v7 }
 0x38c   :  { %2047 = vmatpush3.bf16.msra.mxu1 %v2044_v7  ;;  %v1137_v7 = vld [vmem:[#allocation5 + $0x3a0] sm:$0xff] }
 0x38d   :  { %v2088_v9 = vpack.c.bf16 %v1138_v8, %v1137_v7 }
 0x442   :  { %v1670_v12 = vpop.f32.mrb[8].mxu1 }
 0x443   :  { %v645_v34 = vadd.f32 %v1670_v12, %v1307_v33  ;;  %v639_v13 = vpop.f32.mrb[9].mxu1 }
 0x444   :  { %v640_v35 = vadd.f32 %v1307_v33, %v639_v13 }
 0x445   :  { %v679_v36 = vmul.f32 0.2, %v645_v34 }
 0x446   :  { %v678_v37 = vmul.f32 0.2, %v640_v35  ;;  %v1673_v20 = vpop.f32.mrb[10].mxu1 }
 0x447   :  { %v655_v38 = vadd.f32 %v1673_v20, %v1307_v33  ;;  %v649_v39 = vpop.f32.mrb[11].mxu1  ;;  %v687_v41 = vmax.f32 %v645_v34, %v679_v36 }
 0x448   :  { %v686_v21 = vmax.f32 %v640_v35, %v678_v37  ;;  %v650_v40 = vadd.f32 %v1307_v33, %v649_v39 }
 0x449   :  { %v681_v42 = vmul.f32 0.2, %v655_v38 }
 0x44a   :  { %v680_v43 = vmul.f32 0.2, %v650_v40  ;;  %v1676_v44 = vpop.f32.mrb[12].mxu1  ;;  %1712 = vmatprep.mubr.f32.mxu0 %v686_v21 }
 0x44b   :  { %v665_v45 = vadd.f32 %v1676_v44, %v1307_v33  ;;  %v659_v46 = vpop.f32.mrb[13].mxu1  ;;  %1713 = vmatmul.mubr.f32.vlgmr.msra.gmra.mrb[16].mxu0 %v687_v41  ;;  %v689_v49 = vmax.f32 %v655_v38, %v681_v42 }
 0x44c   :  { %v688_v47 = vmax.f32 %v650_v40, %v680_v43  ;;  %v660_v48 = vadd.f32 %v1307_v33, %v659_v46  ;;  %2051 = vmatpush3.bf16.msra.mxu0 %v2048_v11  ;;  %v1140_v11 = vld [vmem:[#allocation5 + $0x3b8] sm:$0xff] }
 0x44d   :  { %v683_v50 = vmul.f32 0.2, %v665_v45  ;;  %2053 = vmatprep.subr.bf16.mxu0 %v2052_v15  ;;  %v2092_v14 = vpack.c.bf16 %v1140_v11, %v1139_v10 }
 0x44e   :  { %v682_v51 = vmul.f32 0.2, %v660_v48  ;;  %v1679_v52 = vpop.f32.mrb[14].mxu1  ;;  %1715 = vmatprep.mubr.f32.mxu0 %v688_v47 }
 0x44f   :  { %v675_v53 = vadd.f32 %v1679_v52, %v1307_v33  ;;  %v669_v54 = vpop.f32.mrb[15].mxu1  ;;  %1716 = vmatmul.mubr.f32.gmra.mrb[18].mxu0 %v689_v49  ;;  %v691_v57 = vmax.f32 %v665_v45, %v683_v50 }
 0x450   :  { %v690_v55 = vmax.f32 %v660_v48, %v682_v51  ;;  %v670_v56 = vadd.f32 %v1307_v33, %v669_v54  ;;  %2055 = vmatpush3.bf16.msra.mxu0 %v2052_v15  ;;  %v1141_v15 = vld [vmem:[#allocation5 + $0x3c0] sm:$0xff] }
 0x451   :  { %v685_v58 = vmul.f32 0.2, %v675_v53  ;;  %2057 = vmatprep.subr.bf16.mxu0 %v2056_v18  ;;  %v2096_v17 = vpack.c.bf16 %v1142_v16, %v1141_v15 }
 0x452   :  { %v684_v59 = vmul.f32 0.2, %v670_v56  ;;  %1718 = vmatprep.mubr.f32.mxu0 %v690_v55  ;;  %v999_v55 = vld [vmem:[#allocation5 + $0x360] sm:$0xff] }
 0x453   :  { %1719 = vmatmul.mubr.f32.gmra.mrb[20].mxu0 %v691_v57  ;;  %v693_v61 = vmax.f32 %v675_v53, %v685_v58  ;;  %v1001_v58 = vld [vmem:[#allocation5 + $0x370] sm:$0xff] }
 0x454   :  { %v692_v60 = vmax.f32 %v670_v56, %v684_v59  ;;  %2059 = vmatpush3.bf16.msra.mxu0 %v2056_v18  ;;  %v1000_v56 = vld [vmem:[#allocation5 + $0x368] sm:$0xff]  ;;  %v1002_v59 = vld [vmem:[#allocation5 + $0x378] sm:$0xff]  ;;  %v1143_v18 = vld [vmem:[#allocation5 + $0x3d0] sm:$0xff] }
 0x455   :  { %2061 = vmatprep.subr.bf16.mxu0 %v2060_v23  ;;  %v2072_v57 = vpack.c.bf16 %v1000_v56, %v999_v55  ;;  %v2100_v22 = vpack.c.bf16 %v1144_v19, %v1143_v18 }
 0x456   :  { %1721 = vmatprep.mubr.f32.mxu0 %v692_v60  ;;  %v2076_v60 = vpack.c.bf16 %v1002_v59, %v1001_v58 }
 0x457   :  { %1722 = vmatmul.mubr.f32.gmra.mrb[22].mxu0 %v693_v61  ;;  %v1133_v61 = vld [vmem:[#allocation5 + $0x380] sm:$0xff] }
 0x458   :  { %2063 = vmatpush3.bf16.msra.mxu0 %v2060_v23  ;;  %v2080_v3 = vpack.c.bf16 %v1134_v62, %v1133_v61  ;;  %v1309_v23 = vld [vmem:[#allocation7 + $0x5] ss:$0 sm:$0xff] }
 0x459   :  { %2065 = vmatprep.subr.bf16.mxu0 %v2064_v26 }
 0x45a   :  { %2081 = vmatprep.subr.bf16.mxu1 %v2080_v3 }
 0x45c   :  { %2067 = vmatpush3.bf16.msra.mxu0 %v2064_v26 }
 0x45d   :  { %2069 = vmatprep.subr.bf16.mxu0 %v2068_v0 }
 0x460   :  { %2071 = vmatpush3.bf16.msra.mxu0 %v2068_v0 }
 0x461   :  { %2073 = vmatprep.subr.bf16.mxu0 %v2072_v57 }
 0x464   :  { %2075 = vmatpush3.bf16.msra.mxu0 %v2072_v57 }
 0x465   :  { %2077 = vmatprep.subr.bf16.mxu0 %v2076_v60 }
 0x468   :  { %2079 = vmatpush3.bf16.msra.mxu0 %v2076_v60 }
 0x51e   :  { %v1714_v30 = vpop.f32.mrb[16].mxu0 }
 0x51f   :  { %v791_v31 = vadd.f32 %v1714_v30, %v1308_v29  ;;  %v785_v1 = vpop.f32.mrb[17].mxu0 }
 0x520   :  { %v786_v2 = vadd.f32 %v1308_v29, %v785_v1 }
 0x521   :  { %v825_v5 = vmul.f32 0.2, %v791_v31 }
 0x522   :  { %v824_v32 = vmul.f32 0.2, %v786_v2  ;;  %v1717_v33 = vpop.f32.mrb[18].mxu0 }
 0x523   :  { %v801_v12 = vadd.f32 %v1717_v33, %v1308_v29  ;;  %v795_v34 = vpop.f32.mrb[19].mxu0  ;;  %v833_v36 = vmax.f32 %v791_v31, %v825_v5 }
 0x524   :  { %v832_v13 = vmax.f32 %v786_v2, %v824_v32  ;;  %v796_v35 = vadd.f32 %v1308_v29, %v795_v34 }
 0x525   :  { %v827_v37 = vmul.f32 0.2, %v801_v12 }
 0x526   :  { %v826_v20 = vmul.f32 0.2, %v796_v35  ;;  %v1720_v38 = vpop.f32.mrb[20].mxu0  ;;  %1756 = vmatprep.mubr.f32.mxu1 %v832_v13 }
 0x527   :  { %v811_v39 = vadd.f32 %v1720_v38, %v1308_v29  ;;  %v805_v21 = vpop.f32.mrb[21].mxu0  ;;  %1757 = vmatmul.mubr.f32.vlgmr.msra.gmra.mrb[16].mxu1 %v833_v36  ;;  %v835_v42 = vmax.f32 %v801_v12, %v827_v37 }
 0x528   :  { %v834_v40 = vmax.f32 %v796_v35, %v826_v20  ;;  %v806_v41 = vadd.f32 %v1308_v29, %v805_v21  ;;  %2083 = vmatpush3.bf16.msra.mxu1 %v2080_v3 }
 0x529   :  { %v829_v43 = vmul.f32 0.2, %v811_v39  ;;  %2085 = vmatprep.subr.bf16.mxu1 %v2084_v6 }
 0x52a   :  { %v828_v44 = vmul.f32 0.2, %v806_v41  ;;  %v1723_v45 = vpop.f32.mrb[22].mxu0  ;;  %1759 = vmatprep.mubr.f32.mxu1 %v834_v40 }
 0x52b   :  { %v821_v46 = vadd.f32 %v1723_v45, %v1308_v29  ;;  %v815_v47 = vpop.f32.mrb[23].mxu0  ;;  %1760 = vmatmul.mubr.f32.gmra.mrb[18].mxu1 %v835_v42  ;;  %v837_v50 = vmax.f32 %v811_v39, %v829_v43 }
 0x52c   :  { %v836_v48 = vmax.f32 %v806_v41, %v828_v44  ;;  %v816_v49 = vadd.f32 %v1308_v29, %v815_v47  ;;  %2087 = vmatpush3.bf16.msra.mxu1 %v2084_v6 }
 0x52d   :  { %v831_v51 = vmul.f32 0.2, %v821_v46  ;;  %2089 = vmatprep.subr.bf16.mxu1 %v2088_v9 }
 0x52e   :  { %v830_v52 = vmul.f32 0.2, %v816_v49  ;;  %1762 = vmatprep.mubr.f32.mxu1 %v836_v48  ;;  %v1145_v48 = vld [vmem:[#allocation5 + $0x3e0] sm:$0xff] }
 0x52f   :  { %1763 = vmatmul.mubr.f32.gmra.mrb[20].mxu1 %v837_v50  ;;  %v839_v54 = vmax.f32 %v821_v46, %v831_v51  ;;  %v1147_v51 = vld [vmem:[#allocation5 + $0x3f0] sm:$0xff] }
 0x530   :  { %v838_v53 = vmax.f32 %v816_v49, %v830_v52  ;;  %2091 = vmatpush3.bf16.msra.mxu1 %v2088_v9  ;;  %v1146_v49 = vld [vmem:[#allocation5 + $0x3e8] sm:$0xff]  ;;  %v1148_v52 = vld [vmem:[#allocation5 + $0x3f8] sm:$0xff] }
 0x531   :  { %2093 = vmatprep.subr.bf16.mxu1 %v2092_v14  ;;  %v2104_v50 = vpack.c.bf16 %v1146_v49, %v1145_v48 }
 0x532   :  { %1765 = vmatprep.mubr.f32.mxu1 %v838_v53  ;;  %v2108_v53 = vpack.c.bf16 %v1148_v52, %v1147_v51 }
 0x533   :  { %1766 = vmatmul.mubr.f32.gmra.mrb[22].mxu1 %v839_v54  ;;  %v1310_v54 = vld [vmem:[#allocation7 + $0x6] ss:$0 sm:$0xff] }
 0x534   :  { %2095 = vmatpush3.bf16.msra.mxu1 %v2092_v14 }
 0x535   :  { %2097 = vmatprep.subr.bf16.mxu1 %v2096_v17 }
 0x538   :  { %2099 = vmatpush3.bf16.msra.mxu1 %v2096_v17 }
 0x539   :  { %2101 = vmatprep.subr.bf16.mxu1 %v2100_v22 }
 0x53c   :  { %2103 = vmatpush3.bf16.msra.mxu1 %v2100_v22 }
 0x53d   :  { %2105 = vmatprep.subr.bf16.mxu1 %v2104_v50 }
 0x540   :  { %2107 = vmatpush3.bf16.msra.mxu1 %v2104_v50 }
 0x541   :  { %2109 = vmatprep.subr.bf16.mxu1 %v2108_v53 }
 0x544   :  { %2111 = vmatpush3.bf16.msra.mxu1 %v2108_v53 }
 0x5fa   :  { %v1758_v24 = vpop.f32.mrb[16].mxu1 }
 0x5fb   :  { %v937_v25 = vadd.f32 %v1758_v24, %v1309_v23  ;;  %v931_v26 = vpop.f32.mrb[17].mxu1 }
 0x5fc   :  { %v932_v27 = vadd.f32 %v1309_v23, %v931_v26 }
 0x5fd   :  { %v971_v28 = vmul.f32 0.2, %v937_v25 }
 0x5fe   :  { %v970_v0 = vmul.f32 0.2, %v932_v27  ;;  %v1761_v29 = vpop.f32.mrb[18].mxu1 }
 0x5ff   :  { %v947_v30 = vadd.f32 %v1761_v29, %v1309_v23  ;;  %v941_v31 = vpop.f32.mrb[19].mxu1  ;;  %v979_v5 = vmax.f32 %v937_v25, %v971_v28 }
 0x600   :  { %v978_v1 = vmax.f32 %v932_v27, %v970_v0  ;;  %v942_v2 = vadd.f32 %v1309_v23, %v941_v31 }
 0x601   :  { %v973_v32 = vmul.f32 0.2, %v947_v30 }
 0x602   :  { %v972_v33 = vmul.f32 0.2, %v942_v2  ;;  %v1764_v12 = vpop.f32.mrb[20].mxu1  ;;  %1800 = vmatprep.mubr.f32.mxu0 %v978_v1 }
 0x603   :  { %v957_v34 = vadd.f32 %v1764_v12, %v1309_v23  ;;  %v951_v13 = vpop.f32.mrb[21].mxu1  ;;  %1801 = vmatmul.mubr.f32.vlgmr.msra.gmra.mrb[24].mxu0 %v979_v5  ;;  %v981_v37 = vmax.f32 %v947_v30, %v973_v32  ;;  %v1311_v30 = vld [vmem:[#allocation7 + $0x7] ss:$0 sm:$0xff] }
 0x604   :  { %v980_v35 = vmax.f32 %v942_v2, %v972_v33  ;;  %v952_v36 = vadd.f32 %v1309_v23, %v951_v13 }
 0x605   :  { %v975_v20 = vmul.f32 0.2, %v957_v34 }
 0x606   :  { %v974_v38 = vmul.f32 0.2, %v952_v36  ;;  %v1767_v39 = vpop.f32.mrb[22].mxu1  ;;  %1803 = vmatprep.mubr.f32.mxu0 %v980_v35 }
 0x607   :  { %v967_v21 = vadd.f32 %v1767_v39, %v1309_v23  ;;  %v961_v40 = vpop.f32.mrb[23].mxu1  ;;  %1804 = vmatmul.mubr.f32.gmra.mrb[26].mxu0 %v981_v37  ;;  %v983_v43 = vmax.f32 %v957_v34, %v975_v20 }
 0x608   :  { %v982_v41 = vmax.f32 %v952_v36, %v974_v38  ;;  %v962_v42 = vadd.f32 %v1309_v23, %v961_v40 }
 0x609   :  { %v977_v44 = vmul.f32 0.2, %v967_v21 }
 0x60a   :  { %v976_v45 = vmul.f32 0.2, %v962_v42  ;;  %1806 = vmatprep.mubr.f32.mxu0 %v982_v41 }
 0x60b   :  { %1807 = vmatmul.mubr.f32.gmra.mrb[28].mxu0 %v983_v43  ;;  %v985_v47 = vmax.f32 %v967_v21, %v977_v44 }
 0x60c   :  { %v984_v46 = vmax.f32 %v962_v42, %v976_v45 }
 0x60e   :  { %1809 = vmatprep.mubr.f32.mxu0 %v984_v46 }
 0x60f   :  { %1810 = vmatmul.mubr.f32.gmra.mrb[30].mxu0 %v985_v47 }
 0x6d6   :  { %v1802_v55 = vpop.f32.mrb[24].mxu0 }
 0x6d7   :  { %v1083_v56 = vadd.f32 %v1802_v55, %v1310_v54  ;;  %v1077_v57 = vpop.f32.mrb[25].mxu0 }
 0x6d8   :  { %v1078_v58 = vadd.f32 %v1310_v54, %v1077_v57 }
 0x6d9   :  { %v1117_v59 = vmul.f32 0.2, %v1083_v56 }
 0x6da   :  { %v1116_v60 = vmul.f32 0.2, %v1078_v58  ;;  %v1805_v61 = vpop.f32.mrb[26].mxu0 }
 0x6db   :  { %v1093_v62 = vadd.f32 %v1805_v61, %v1310_v54  ;;  %v1087_v63 = vpop.f32.mrb[27].mxu0  ;;  %v1125_v6 = vmax.f32 %v1083_v56, %v1117_v59 }
 0x6dc   :  { %v1124_v3 = vmax.f32 %v1078_v58, %v1116_v60  ;;  %v1088_v4 = vadd.f32 %v1310_v54, %v1087_v63 }
 0x6dd   :  { %v1119_v7 = vmul.f32 0.2, %v1093_v62 }
 0x6de   :  { %v1118_v8 = vmul.f32 0.2, %v1088_v4  ;;  %v1808_v9 = vpop.f32.mrb[28].mxu0  ;;  %1844 = vmatprep.mubr.f32.mxu1 %v1124_v3 }
 0x6df   :  { %v1103_v10 = vadd.f32 %v1808_v9, %v1310_v54  ;;  %v1097_v11 = vpop.f32.mrb[29].mxu0  ;;  %1845 = vmatmul.mubr.f32.vlgmr.msra.gmra.mrb[24].mxu1 %v1125_v6  ;;  %v1127_v16 = vmax.f32 %v1093_v62, %v1119_v7 }
 0x6e0   :  { %v1126_v14 = vmax.f32 %v1088_v4, %v1118_v8  ;;  %v1098_v15 = vadd.f32 %v1310_v54, %v1097_v11 }
 0x6e1   :  { %v1121_v17 = vmul.f32 0.2, %v1103_v10 }
 0x6e2   :  { %v1120_v18 = vmul.f32 0.2, %v1098_v15  ;;  %v1811_v19 = vpop.f32.mrb[30].mxu0  ;;  %1847 = vmatprep.mubr.f32.mxu1 %v1126_v14 }
 0x6e3   :  { %v1113_v22 = vadd.f32 %v1811_v19, %v1310_v54  ;;  %v1107_v23 = vpop.f32.mrb[31].mxu0  ;;  %1848 = vmatmul.mubr.f32.gmra.mrb[26].mxu1 %v1127_v16  ;;  %v1129_v26 = vmax.f32 %v1103_v10, %v1121_v17 }
 0x6e4   :  { %v1128_v24 = vmax.f32 %v1098_v15, %v1120_v18  ;;  %v1108_v25 = vadd.f32 %v1310_v54, %v1107_v23 }
 0x6e5   :  { %v1123_v27 = vmul.f32 0.2, %v1113_v22 }
 0x6e6   :  { %v1122_v28 = vmul.f32 0.2, %v1108_v25  ;;  %1850 = vmatprep.mubr.f32.mxu1 %v1128_v24 }
 0x6e7   :  { %1851 = vmatmul.mubr.f32.gmra.mrb[28].mxu1 %v1129_v26  ;;  %v1131_v29 = vmax.f32 %v1113_v22, %v1123_v27 }
 0x6e8   :  { %v1130_v0 = vmax.f32 %v1108_v25, %v1122_v28 }
 0x6ea   :  { %1853 = vmatprep.mubr.f32.mxu1 %v1130_v0 }
 0x6eb   :  { %1854 = vmatmul.mubr.f32.gmra.mrb[30].mxu1 %v1131_v29 }
 0x7b2   :  { %v1846_v31 = vpop.f32.mrb[24].mxu1 }
 0x7b3   :  { %v1229_v1 = vadd.f32 %v1846_v31, %v1311_v30  ;;  %v1223_v2 = vpop.f32.mrb[25].mxu1 }
 0x7b4   :  { %v1224_v5 = vadd.f32 %v1311_v30, %v1223_v2 }
 0x7b5   :  { %v1263_v32 = vmul.f32 0.2, %v1229_v1 }
 0x7b6   :  { %v1262_v33 = vmul.f32 0.2, %v1224_v5  ;;  %v1849_v12 = vpop.f32.mrb[26].mxu1 }
 0x7b7   :  { %v1271_v34 = vmax.f32 %v1229_v1, %v1263_v32  ;;  %v1239_v13 = vadd.f32 %v1849_v12, %v1311_v30  ;;  %v1233_v35 = vpop.f32.mrb[27].mxu1 }
 0x7b8   :  { %v1270_v36 = vmax.f32 %v1224_v5, %v1262_v33  ;;  %v1234_v37 = vadd.f32 %v1311_v30, %v1233_v35 }
 0x7b9   :  { %1279 = vst [vmem:[#allocation8 + $0x8] sm:$0xff] %v1271_v34  ;;  %v1265_v20 = vmul.f32 0.2, %v1239_v13 }
 0x7ba   :  { %1278 = vst [vmem:[#allocation8] sm:$0xff] %v1270_v36  ;;  %v1264_v38 = vmul.f32 0.2, %v1234_v37  ;;  %v1852_v39 = vpop.f32.mrb[28].mxu1 }
 0x7bb   :  { %v1273_v21 = vmax.f32 %v1239_v13, %v1265_v20  ;;  %v1249_v40 = vadd.f32 %v1852_v39, %v1311_v30  ;;  %v1243_v41 = vpop.f32.mrb[29].mxu1 }
 0x7bc   :  { %v1272_v42 = vmax.f32 %v1234_v37, %v1264_v38  ;;  %v1244_v43 = vadd.f32 %v1311_v30, %v1243_v41 }
 0x7bd   :  { %1281 = vst [vmem:[#allocation8 + $0x18] sm:$0xff] %v1273_v21  ;;  %v1267_v44 = vmul.f32 0.2, %v1249_v40 }
 0x7be   :  { %1280 = vst [vmem:[#allocation8 + $0x10] sm:$0xff] %v1272_v42  ;;  %v1266_v45 = vmul.f32 0.2, %v1244_v43  ;;  %v1855_v46 = vpop.f32.mrb[30].mxu1 }
 0x7bf   :  { %v1275_v47 = vmax.f32 %v1249_v40, %v1267_v44  ;;  %v1259_v48 = vadd.f32 %v1855_v46, %v1311_v30  ;;  %v1253_v49 = vpop.f32.mrb[31].mxu1 }
 0x7c0   :  { %v1274_v50 = vmax.f32 %v1244_v43, %v1266_v45  ;;  %v1254_v51 = vadd.f32 %v1311_v30, %v1253_v49 }
 0x7c1   :  { %1283 = vst [vmem:[#allocation8 + $0x28] sm:$0xff] %v1275_v47  ;;  %v1269_v52 = vmul.f32 0.2, %v1259_v48 }
 0x7c2   :  { %1282 = vst [vmem:[#allocation8 + $0x20] sm:$0xff] %v1274_v50  ;;  %v1268_v53 = vmul.f32 0.2, %v1254_v51 }
 0x7c3   :  { %v1277_v54 = vmax.f32 %v1259_v48, %v1269_v52 }
 0x7c4   :  { %v1276_v55 = vmax.f32 %v1254_v51, %v1268_v53 }
 0x7c5   :  { %1285 = vst [vmem:[#allocation8 + $0x38] sm:$0xff] %v1277_v54 }
 0x7c6   :  { %1284 = vst [vmem:[#allocation8 + $0x30] sm:$0xff] %v1276_v55 }
 0x7c7   :  { %2213 = shalt.err (!%p2210_p0)
}
 0x7c8   :  { %s2214_s29 = scalar_lea.hbm %s2365_s3, 1024 }
 0x7c9   :  { %p2215_p1 = scmp.ne.s32.totalorder %s2365_s3, %s2214_s29  ;;  %p2218_p2 = scmp.lt.u32.totalorder %s2214_s29, %s2365_s3 }
 0x7cb   :  { %p2220_p3 = pnand %p2218_p2, %p2215_p1 }
 0x7cd   :  { %2223 = shalt.err (!%p2220_p3)
}
 0x7ce   :  { %1297 = dma.vmem_to_hbm [thread:$0]  %s1292_s23, 1024, %s2365_s3, [#allocation4], %s2232_s24, %s2232_s24, %s2233_s25  }
 0x7cf   :  { %2228 = dma.done.wait [#allocation4], 1024  }
 0x7d0   :  { %2229 = vsyncadd [#allocation4], 4294966272 }
 0x7d1   :  { %1301 = vsyncpa [#allocation3], 1 }
 0x7d2   :  { %1302 = vsyncpa [#allocation6], 1 }
 0x7d3   :  { %1303 = vsyncpa [#allocation4], 1 }

</bundles_post_ra>
